<compile_context>
chip_gen: v5e
topology: v5e:2x2
jax: 0.10.0
libtpu: 0.0.40
codegen_flags: <defaults>
</compile_context>

<pallas_src>
import jax
import jax.numpy as jnp
import numpy as np
from jax.experimental import pallas as pl
from jax.experimental.pallas import tpu as pltpu

EPS = 1e-5


def _vmem_limit_bytes():
    # Generation-aware VMEM budget: ~75% of physical (v7x: 64 MiB -> 48 MiB,
    # v5e/v6e: 128 MiB -> 96 MiB), capped at 100 MiB.
    try:
        cap = int(pltpu.get_tpu_info().vmem_capacity_bytes)
    except Exception:  # no / unknown TPU info -> v7x-safe default
        cap = 64 * 1024 * 1024
    return min(cap * 3 // 4, 100 * 1024 * 1024)


_VMEM_LIMIT = _vmem_limit_bytes()


def _compiler_params():
    return pltpu.CompilerParams(
        dimension_semantics=("parallel",),   # batch axis -> both TCs on v7x
        vmem_limit_bytes=_VMEM_LIMIT,
    )


# ----------------------------------------------------------------------------
# Shared helper: 3x3 "same" conv as 9 shifted-tap MXU matmuls (no im2col).
# ----------------------------------------------------------------------------
def _conv3x3_taps(a, w_ref, m_ref, W):
    # a:     (Cin, H*W) f32 activation (spatial axis minor / lane-dense)
    # w_ref: (9, Cout, Cin) bf16 per-tap weights, tap t = (ky, kx) = (t//3, t%3)
    # m_ref: (9, 1, H*W) f32 0/1 boundary masks (zero padding semantics)
    # returns (Cout, H*W) f32
    HW = a.shape[-1]
    cout = w_ref.shape[1]
    acc = jnp.zeros((cout, HW), jnp.float32)
    for t in range(9):
        dy, dx = t // 3 - 1, t % 3 - 1
        if dy == 0 and dx == 0:
            tap = a                                   # center tap: no shift/mask
        else:
            # tap[:, r] = a[:, r + dy*W + dx] (lane roll on the XLU), then zero
            # the lanes whose source falls outside the image.
            xs = pltpu.roll(a, shift=(-(dy * W + dx)) % HW, axis=1)
            tap = xs * m_ref[t]
        # bf16 MXU operands, f32 accumulation.
        acc = acc + jnp.dot(w_ref[t], tap.astype(jnp.bfloat16),
                            preferred_element_type=jnp.float32)
    return acc


# ----------------------------------------------------------------------------
# Kernel 1: conv1 + per-image BN1 partial statistics (sum, sum of squares).
# ----------------------------------------------------------------------------
def _conv_stats_kernel(W):
    def kernel(x_ref, w_ref, m_ref, y_ref, s_ref, q_ref):
        acc = _conv3x3_taps(x_ref[0].astype(jnp.float32), w_ref, m_ref, W)
        y_ref[0] = acc.astype(y_ref.dtype)            # bf16 HBM intermediate
        # Stats from the f32 accumulator, before the bf16 downcast.
        # (Could move to the MXU as a ones-matvec to free the XLU at big tiles.)
        s_ref[0] = jnp.sum(acc, axis=1, keepdims=True)
        q_ref[0] = jnp.sum(acc * acc, axis=1, keepdims=True)
    return kernel


def conv3x3_with_stats(x, w_taps, masks, W):
    N, cin, HW = x.shape
    cout = w_taps.shape[1]
    return pl.pallas_call(
        _conv_stats_kernel(W),
        out_shape=(
            jax.ShapeDtypeStruct((N, cout, HW), jnp.bfloat16),
            jax.ShapeDtypeStruct((N, cout, 1), jnp.float32),
            jax.ShapeDtypeStruct((N, cout, 1), jnp.float32),
        ),
        grid=(N,),
        in_specs=[
            pl.BlockSpec((1, cin, HW), lambda n: (n, 0, 0)),
            pl.BlockSpec((9, cout, cin), lambda n: (0, 0, 0)),
            pl.BlockSpec((9, 1, HW), lambda n: (0, 0, 0)),
        ],
        out_specs=(
            pl.BlockSpec((1, cout, HW), lambda n: (n, 0, 0)),
            pl.BlockSpec((1, cout, 1), lambda n: (n, 0, 0)),
            pl.BlockSpec((1, cout, 1), lambda n: (n, 0, 0)),
        ),
        compiler_params=_compiler_params(),
    )(x, w_taps, masks)


# ----------------------------------------------------------------------------
# Kernel 2: fused BN1 affine + ReLU + conv2 + per-image BN2 partial statistics.
# ----------------------------------------------------------------------------
def _bn_relu_conv_stats_kernel(W):
    def kernel(y1_ref, sc_ref, sh_ref, w_ref, m_ref, y2_ref, s_ref, q_ref):
        a = jnp.maximum(
            y1_ref[0].astype(jnp.float32) * sc_ref[...] + sh_ref[...], 0.0)
        acc = _conv3x3_taps(a, w_ref, m_ref, W)
        y2_ref[0] = acc.astype(y2_ref.dtype)
        s_ref[0] = jnp.sum(acc, axis=1, keepdims=True)
        q_ref[0] = jnp.sum(acc * acc, axis=1, keepdims=True)
    return kernel


def bn_relu_conv3x3_with_stats(y1, scale, shift, w_taps, masks, W):
    N, cin, HW = y1.shape
    cout = w_taps.shape[1]
    return pl.pallas_call(
        _bn_relu_conv_stats_kernel(W),
        out_shape=(
            jax.ShapeDtypeStruct((N, cout, HW), jnp.bfloat16),
            jax.ShapeDtypeStruct((N, cout, 1), jnp.float32),
            jax.ShapeDtypeStruct((N, cout, 1), jnp.float32),
        ),
        grid=(N,),
        in_specs=[
            pl.BlockSpec((1, cin, HW), lambda n: (n, 0, 0)),
            pl.BlockSpec((cin, 1), lambda n: (0, 0)),
            pl.BlockSpec((cin, 1), lambda n: (0, 0)),
            pl.BlockSpec((9, cout, cin), lambda n: (0, 0, 0)),
            pl.BlockSpec((9, 1, HW), lambda n: (0, 0, 0)),
        ],
        out_specs=(
            pl.BlockSpec((1, cout, HW), lambda n: (n, 0, 0)),
            pl.BlockSpec((1, cout, 1), lambda n: (n, 0, 0)),
            pl.BlockSpec((1, cout, 1), lambda n: (n, 0, 0)),
        ),
        compiler_params=_compiler_params(),
    )(y1, scale, shift, w_taps, masks)


# ----------------------------------------------------------------------------
# Kernel 3: fused BN2 affine + ReLU (-> feature) + MaxPool2d(2, 2) (-> pooled).
# ----------------------------------------------------------------------------
def _bn_relu_pool_kernel(H, W):
    HW = H * W

    def kernel(y2_ref, sc_ref, sh_ref, p_ref, feat_ref, pool_ref):
        f = jnp.maximum(
            y2_ref[0].astype(jnp.float32) * sc_ref[...] + sh_ref[...], 0.0)
        feat_ref[0] = f                               # lane-dense full-width store
        # 2x2/2 max pool: pair-max via two lane rolls, then compact the
        # (even-row, even-col) lanes with a 0/1 selection matmul (exact gather).
        m = jnp.maximum(f, pltpu.roll(f, shift=HW - 1, axis=1))   # cols j, j+1
        m = jnp.maximum(m, pltpu.roll(m, shift=HW - W, axis=1))   # rows i, i+1
        pool_ref[0] = jnp.dot(m, p_ref[...], preferred_element_type=jnp.float32)
    return kernel


def bn_relu_maxpool(y2, scale, shift, pool_sel, H, W):
    N, C, HW = y2.shape
    HWq = HW // 4
    return pl.pallas_call(
        _bn_relu_pool_kernel(H, W),
        out_shape=(
            jax.ShapeDtypeStruct((N, C, HW), jnp.float32),
            jax.ShapeDtypeStruct((N, C, HWq), jnp.float32),
        ),
        grid=(N,),
        in_specs=[
            pl.BlockSpec((1, C, HW), lambda n: (n, 0, 0)),
            pl.BlockSpec((C, 1), lambda n: (0, 0)),
            pl.BlockSpec((C, 1), lambda n: (0, 0)),
            pl.BlockSpec((HW, HWq), lambda n: (0, 0)),
        ],
        out_specs=(
            pl.BlockSpec((1, C, HW), lambda n: (n, 0, 0)),
            pl.BlockSpec((1, C, HWq), lambda n: (n, 0, 0)),
        ),
        compiler_params=_compiler_params(),
    )(y2, scale, shift, pool_sel)


# ----------------------------------------------------------------------------
# Compile-time constants (built with numpy -> baked as literals under jit).
# ----------------------------------------------------------------------------
def _tap_masks(H, W):
    # masks[t, 0, r] = 1 iff output position r=(i,j) has its tap-t source
    # (i + t//3 - 1, j + t%3 - 1) inside the image (zero padding elsewhere).
    i = np.arange(H * W) // W
    j = np.arange(H * W) % W
    rows = []
    for t in range(9):
        dy, dx = t // 3 - 1, t % 3 - 1
        rows.append((i + dy >= 0) & (i + dy < H) & (j + dx >= 0) & (j + dx < W))
    return jnp.asarray(np.stack(rows)[:, None, :], jnp.float32)      # (9, 1, HW)


def _pool_select(H, W):
    # P[r, q] = 1 iff flattened input lane r == 2*i'*W + 2*j' for output q=(i',j').
    Wq = W // 2
    q = np.arange((H // 2) * Wq)
    src = 2 * (q // Wq) * W + 2 * (q % Wq)
    r = np.arange(H * W)
    return jnp.asarray((r[:, None] == src[None, :]).astype(np.float32))  # (HW, HW/4)


# ----------------------------------------------------------------------------
# Wrapper-side BN finalize: (C,)-sized math, negligible.
# ----------------------------------------------------------------------------
def _bn_scale_shift(s, q, gamma, beta, count):
    # s, q: (N, C, 1) per-image partial sum / sum-of-squares of the conv output.
    total = jnp.sum(s, axis=(0, 2))
    total_sq = jnp.sum(q, axis=(0, 2))
    mean = total / count
    var = jnp.maximum(total_sq / count - mean * mean, 0.0)  # biased var (training fwd)
    scale = gamma * jax.lax.rsqrt(var + EPS)
    shift = beta - mean * scale
    return (scale.reshape(-1, 1).astype(jnp.float32),
            shift.reshape(-1, 1).astype(jnp.float32))


# ----------------------------------------------------------------------------
# contract_block forward (NCHW in / NCHW out, matching the PyTorch module)
# ----------------------------------------------------------------------------
def contract_block_forward(x_nchw, params):
    N, cin, H, W = x_nchw.shape
    HW = H * W
    cout = params["w1"].shape[0]
    count = jnp.float32(N * HW)

    # PyTorch Conv2d weight (Cout, Cin, 3, 3) -> per-tap (9, Cout, Cin) bf16
    # matrices, tap t = (ky, kx) = (t//3, t%3).  Tiny one-off ops.
    w1t = jnp.transpose(params["w1"], (2, 3, 0, 1)).reshape(9, cout, cin)
    w2t = jnp.transpose(params["w2"], (2, 3, 0, 1)).reshape(9, cout, cout)
    w1t = w1t.astype(jnp.bfloat16)
    w2t = w2t.astype(jnp.bfloat16)

    masks = _tap_masks(H, W)        # (9, 1, HW) f32, shared by both convs
    pool_sel = _pool_select(H, W)   # (HW, HW//4) f32

    # NCHW -> (N, C, H*W): a free reshape (no transpose), spatial axis lane-dense.
    x = x_nchw.reshape(N, cin, HW).astype(jnp.float32)

    y1, s1, q1 = conv3x3_with_stats(x, w1t, masks, W)
    sc1, sh1 = _bn_scale_shift(s1, q1, params["g1"], params["b1"], count)
    y2, s2, q2 = bn_relu_conv3x3_with_stats(y1, sc1, sh1, w2t, masks, W)
    sc2, sh2 = _bn_scale_shift(s2, q2, params["g2"], params["b2"], count)
    feature, pooled = bn_relu_maxpool(y2, sc2, sh2, pool_sel, H, W)

    # Free reshapes back to NCHW.
    return (feature.reshape(N, cout, H, W),
            pooled.reshape(N, cout, H // 2, W // 2))


def make_params(key, inp, outp):
    k1, k2, kg1, kb1, kg2, kb2 = jax.random.split(key, 6)
    return {
        "w1": 0.1 * jax.random.normal(k1, (outp, inp, 3, 3), jnp.float32),
        "w2": 0.1 * jax.random.normal(k2, (outp, outp, 3, 3), jnp.float32),
        "g1": 1.0 + 0.1 * jax.random.normal(kg1, (outp,), jnp.float32),
        "b1": 0.1 * jax.random.normal(kb1, (outp,), jnp.float32),
        "g2": 1.0 + 0.1 * jax.random.normal(kg2, (outp,), jnp.float32),
        "b2": 0.1 * jax.random.normal(kb2, (outp,), jnp.float32),
    }


# Pure-JAX reference of the PyTorch module (training-mode BN) for validation.
def reference_forward(x, params):
    def conv(h, w):
        return jax.lax.conv_general_dilated(
            h, w, window_strides=(1, 1), padding="SAME",
            dimension_numbers=("NCHW", "OIHW", "NCHW"),
            precision=jax.lax.Precision.HIGHEST)

    def bn_relu(y, g, b):
        mean = jnp.mean(y, axis=(0, 2, 3), keepdims=True)
        var = jnp.mean((y - mean) ** 2, axis=(0, 2, 3), keepdims=True)
        yn = (y - mean) * jax.lax.rsqrt(var + EPS)
        return jnp.maximum(yn * g.reshape(1, -1, 1, 1) + b.reshape(1, -1, 1, 1), 0.0)

    h = bn_relu(conv(x, params["w1"]), params["g1"], params["b1"])
    f = bn_relu(conv(h, params["w2"]), params["g2"], params["b2"])
    n, c, hh, ww = f.shape
    p = jnp.max(f.reshape(n, c, hh // 2, 2, ww // 2, 2), axis=(3, 5))
    return f, p


if __name__ == "__main__":
    key = jax.random.PRNGKey(0)
    kx, kp = jax.random.split(key)

    N, Cin, H, W = 2, 4, 16, 16
    Cout = 8

    x = jax.random.normal(kx, (N, Cin, H, W), jnp.float32)
    params = make_params(kp, Cin, Cout)

    fwd = jax.jit(contract_block_forward)
    feature, pooled = fwd(x, params)
    jax.block_until_ready((feature, pooled))

    assert feature.shape == (N, Cout, H, W), feature.shape
    assert pooled.shape == (N, Cout, H // 2, W // 2), pooled.shape
    assert bool(jnp.all(feature >= 0.0))  # ReLU output

    # Tolerance sized for bf16 MXU operands + bf16 HBM intermediates across two
    # chained conv+BN stages (reference is f32 / HIGHEST precision).
    f_ref, p_ref = reference_forward(x, params)
    assert bool(jnp.allclose(feature, f_ref, rtol=5e-2, atol=5e-2)), (
        float(jnp.max(jnp.abs(feature - f_ref))))
    assert bool(jnp.allclose(pooled, p_ref, rtol=5e-2, atol=5e-2)), (
        float(jnp.max(jnp.abs(pooled - p_ref))))

    print("KERNEL_OK")
</pallas_src>

<mosaic_0001>
module attributes {stable_mosaic.version = 11 : i64} {
  func.func @kernel(%arg0: i32, %arg1: memref<1x4x256xf32, #tpu.memory_space<vmem>>, %arg2: memref<9x8x4xbf16, #tpu.memory_space<vmem>>, %arg3: memref<9x1x256xf32, #tpu.memory_space<vmem>>, %arg4: memref<1x8x256xbf16, #tpu.memory_space<vmem>>, %arg5: memref<1x8x1xf32, #tpu.memory_space<vmem>>, %arg6: memref<1x8x1xf32, #tpu.memory_space<vmem>>) attributes {dimension_semantics = [#tpu.dimension_semantics<parallel>], iteration_bounds = array<i64: 2>, scalar_prefetch = 0 : i64, scratch_operands = 0 : i64, tpu.core_type = #tpu.core_type<tc>, window_params = [{transform_indices = @transform_0, window_bounds = array<i64: 1, 4, 256>}, {pipeline_mode = #tpu.pipeline_mode<synchronous>, transform_indices = @transform_1, window_bounds = array<i64: 9, 8, 4>}, {pipeline_mode = #tpu.pipeline_mode<synchronous>, transform_indices = @transform_2, window_bounds = array<i64: 9, 1, 256>}, {transform_indices = @transform_3, window_bounds = array<i64: 1, 8, 256>}, {transform_indices = @transform_4, window_bounds = array<i64: 1, 8, 1>}, {transform_indices = @transform_5, window_bounds = array<i64: 1, 8, 1>}]} {
    %c0 = arith.constant 0 : index
    %c0_0 = arith.constant 0 : index
    %c0_1 = arith.constant 0 : index
    %0 = vector.load %arg1[%c0, %c0_0, %c0_1] : memref<1x4x256xf32, #tpu.memory_space<vmem>>, vector<1x4x256xf32>
    %1 = vector.shape_cast %0 : vector<1x4x256xf32> to vector<4x256xf32>
    %cst = arith.constant 0.000000e+00 : f32
    %2 = vector.broadcast %cst : f32 to vector<8x256xf32>
    %c17_i32 = arith.constant 17 : i32
    %3 = tpu.dynamic_rotate %1 by %c17_i32 dim 1 : vector<4x256xf32>, i32 -> vector<4x256xf32>
    %c0_2 = arith.constant 0 : index
    %c0_3 = arith.constant 0 : index
    %c0_4 = arith.constant 0 : index
    %4 = vector.load %arg3[%c0_2, %c0_3, %c0_4] : memref<9x1x256xf32, #tpu.memory_space<vmem>>, vector<1x1x256xf32>
    %5 = vector.shape_cast %4 : vector<1x1x256xf32> to vector<1x256xf32>
    %6 = vector.broadcast %5 : vector<1x256xf32> to vector<4x256xf32>
    %7 = arith.mulf %3, %6 : vector<4x256xf32>
    %c0_5 = arith.constant 0 : index
    %c0_6 = arith.constant 0 : index
    %c0_7 = arith.constant 0 : index
    %8 = vector.load %arg2[%c0_5, %c0_6, %c0_7] : memref<9x8x4xbf16, #tpu.memory_space<vmem>>, vector<1x8x4xbf16>
    %9 = vector.shape_cast %8 : vector<1x8x4xbf16> to vector<8x4xbf16>
    %10 = arith.truncf %7 : vector<4x256xf32> to vector<4x256xbf16>
    %cst_8 = arith.constant dense<0.000000e+00> : vector<8x256xf32>
    %11 = tpu.matmul %9, %10, %cst_8 {dimension_numbers = #tpu.dot_dimension_numbers<[1], [0], [0], [1], [0, 0, 1, 1], [], []>} : vector<8x4xbf16>, vector<4x256xbf16>, vector<8x256xf32> -> vector<8x256xf32>
    %12 = arith.addf %2, %11 : vector<8x256xf32>
    %c16_i32 = arith.constant 16 : i32
    %13 = tpu.dynamic_rotate %1 by %c16_i32 dim 1 : vector<4x256xf32>, i32 -> vector<4x256xf32>
    %c1 = arith.constant 1 : index
    %c0_9 = arith.constant 0 : index
    %c0_10 = arith.constant 0 : index
    %14 = vector.load %arg3[%c1, %c0_9, %c0_10] : memref<9x1x256xf32, #tpu.memory_space<vmem>>, vector<1x1x256xf32>
    %15 = vector.shape_cast %14 : vector<1x1x256xf32> to vector<1x256xf32>
    %16 = vector.broadcast %15 : vector<1x256xf32> to vector<4x256xf32>
    %17 = arith.mulf %13, %16 : vector<4x256xf32>
    %c1_11 = arith.constant 1 : index
    %c0_12 = arith.constant 0 : index
    %c0_13 = arith.constant 0 : index
    %18 = vector.load %arg2[%c1_11, %c0_12, %c0_13] : memref<9x8x4xbf16, #tpu.memory_space<vmem>>, vector<1x8x4xbf16>
    %19 = vector.shape_cast %18 : vector<1x8x4xbf16> to vector<8x4xbf16>
    %20 = arith.truncf %17 : vector<4x256xf32> to vector<4x256xbf16>
    %cst_14 = arith.constant dense<0.000000e+00> : vector<8x256xf32>
    %21 = tpu.matmul %19, %20, %cst_14 {dimension_numbers = #tpu.dot_dimension_numbers<[1], [0], [0], [1], [0, 0, 1, 1], [], []>} : vector<8x4xbf16>, vector<4x256xbf16>, vector<8x256xf32> -> vector<8x256xf32>
    %22 = arith.addf %12, %21 : vector<8x256xf32>
    %c15_i32 = arith.constant 15 : i32
    %23 = tpu.dynamic_rotate %1 by %c15_i32 dim 1 : vector<4x256xf32>, i32 -> vector<4x256xf32>
    %c2 = arith.constant 2 : index
    %c0_15 = arith.constant 0 : index
    %c0_16 = arith.constant 0 : index
    %24 = vector.load %arg3[%c2, %c0_15, %c0_16] : memref<9x1x256xf32, #tpu.memory_space<vmem>>, vector<1x1x256xf32>
    %25 = vector.shape_cast %24 : vector<1x1x256xf32> to vector<1x256xf32>
    %26 = vector.broadcast %25 : vector<1x256xf32> to vector<4x256xf32>
    %27 = arith.mulf %23, %26 : vector<4x256xf32>
    %c2_17 = arith.constant 2 : index
    %c0_18 = arith.constant 0 : index
    %c0_19 = arith.constant 0 : index
    %28 = vector.load %arg2[%c2_17, %c0_18, %c0_19] : memref<9x8x4xbf16, #tpu.memory_space<vmem>>, vector<1x8x4xbf16>
    %29 = vector.shape_cast %28 : vector<1x8x4xbf16> to vector<8x4xbf16>
    %30 = arith.truncf %27 : vector<4x256xf32> to vector<4x256xbf16>
    %cst_20 = arith.constant dense<0.000000e+00> : vector<8x256xf32>
    %31 = tpu.matmul %29, %30, %cst_20 {dimension_numbers = #tpu.dot_dimension_numbers<[1], [0], [0], [1], [0, 0, 1, 1], [], []>} : vector<8x4xbf16>, vector<4x256xbf16>, vector<8x256xf32> -> vector<8x256xf32>
    %32 = arith.addf %22, %31 : vector<8x256xf32>
    %c1_i32 = arith.constant 1 : i32
    %33 = tpu.dynamic_rotate %1 by %c1_i32 dim 1 : vector<4x256xf32>, i32 -> vector<4x256xf32>
    %c3 = arith.constant 3 : index
    %c0_21 = arith.constant 0 : index
    %c0_22 = arith.constant 0 : index
    %34 = vector.load %arg3[%c3, %c0_21, %c0_22] : memref<9x1x256xf32, #tpu.memory_space<vmem>>, vector<1x1x256xf32>
    %35 = vector.shape_cast %34 : vector<1x1x256xf32> to vector<1x256xf32>
    %36 = vector.broadcast %35 : vector<1x256xf32> to vector<4x256xf32>
    %37 = arith.mulf %33, %36 : vector<4x256xf32>
    %c3_23 = arith.constant 3 : index
    %c0_24 = arith.constant 0 : index
    %c0_25 = arith.constant 0 : index
    %38 = vector.load %arg2[%c3_23, %c0_24, %c0_25] : memref<9x8x4xbf16, #tpu.memory_space<vmem>>, vector<1x8x4xbf16>
    %39 = vector.shape_cast %38 : vector<1x8x4xbf16> to vector<8x4xbf16>
    %40 = arith.truncf %37 : vector<4x256xf32> to vector<4x256xbf16>
    %cst_26 = arith.constant dense<0.000000e+00> : vector<8x256xf32>
    %41 = tpu.matmul %39, %40, %cst_26 {dimension_numbers = #tpu.dot_dimension_numbers<[1], [0], [0], [1], [0, 0, 1, 1], [], []>} : vector<8x4xbf16>, vector<4x256xbf16>, vector<8x256xf32> -> vector<8x256xf32>
    %42 = arith.addf %32, %41 : vector<8x256xf32>
    %c4 = arith.constant 4 : index
    %c0_27 = arith.constant 0 : index
    %c0_28 = arith.constant 0 : index
    %43 = vector.load %arg2[%c4, %c0_27, %c0_28] : memref<9x8x4xbf16, #tpu.memory_space<vmem>>, vector<1x8x4xbf16>
    %44 = vector.shape_cast %43 : vector<1x8x4xbf16> to vector<8x4xbf16>
    %45 = arith.truncf %1 : vector<4x256xf32> to vector<4x256xbf16>
    %cst_29 = arith.constant dense<0.000000e+00> : vector<8x256xf32>
    %46 = tpu.matmul %44, %45, %cst_29 {dimension_numbers = #tpu.dot_dimension_numbers<[1], [0], [0], [1], [0, 0, 1, 1], [], []>} : vector<8x4xbf16>, vector<4x256xbf16>, vector<8x256xf32> -> vector<8x256xf32>
    %47 = arith.addf %42, %46 : vector<8x256xf32>
    %c255_i32 = arith.constant 255 : i32
    %48 = tpu.dynamic_rotate %1 by %c255_i32 dim 1 : vector<4x256xf32>, i32 -> vector<4x256xf32>
    %c5 = arith.constant 5 : index
    %c0_30 = arith.constant 0 : index
    %c0_31 = arith.constant 0 : index
    %49 = vector.load %arg3[%c5, %c0_30, %c0_31] : memref<9x1x256xf32, #tpu.memory_space<vmem>>, vector<1x1x256xf32>
    %50 = vector.shape_cast %49 : vector<1x1x256xf32> to vector<1x256xf32>
    %51 = vector.broadcast %50 : vector<1x256xf32> to vector<4x256xf32>
    %52 = arith.mulf %48, %51 : vector<4x256xf32>
    %c5_32 = arith.constant 5 : index
    %c0_33 = arith.constant 0 : index
    %c0_34 = arith.constant 0 : index
    %53 = vector.load %arg2[%c5_32, %c0_33, %c0_34] : memref<9x8x4xbf16, #tpu.memory_space<vmem>>, vector<1x8x4xbf16>
    %54 = vector.shape_cast %53 : vector<1x8x4xbf16> to vector<8x4xbf16>
    %55 = arith.truncf %52 : vector<4x256xf32> to vector<4x256xbf16>
    %cst_35 = arith.constant dense<0.000000e+00> : vector<8x256xf32>
    %56 = tpu.matmul %54, %55, %cst_35 {dimension_numbers = #tpu.dot_dimension_numbers<[1], [0], [0], [1], [0, 0, 1, 1], [], []>} : vector<8x4xbf16>, vector<4x256xbf16>, vector<8x256xf32> -> vector<8x256xf32>
    %57 = arith.addf %47, %56 : vector<8x256xf32>
    %c241_i32 = arith.constant 241 : i32
    %58 = tpu.dynamic_rotate %1 by %c241_i32 dim 1 : vector<4x256xf32>, i32 -> vector<4x256xf32>
    %c6 = arith.constant 6 : index
    %c0_36 = arith.constant 0 : index
    %c0_37 = arith.constant 0 : index
    %59 = vector.load %arg3[%c6, %c0_36, %c0_37] : memref<9x1x256xf32, #tpu.memory_space<vmem>>, vector<1x1x256xf32>
    %60 = vector.shape_cast %59 : vector<1x1x256xf32> to vector<1x256xf32>
    %61 = vector.broadcast %60 : vector<1x256xf32> to vector<4x256xf32>
    %62 = arith.mulf %58, %61 : vector<4x256xf32>
    %c6_38 = arith.constant 6 : index
    %c0_39 = arith.constant 0 : index
    %c0_40 = arith.constant 0 : index
    %63 = vector.load %arg2[%c6_38, %c0_39, %c0_40] : memref<9x8x4xbf16, #tpu.memory_space<vmem>>, vector<1x8x4xbf16>
    %64 = vector.shape_cast %63 : vector<1x8x4xbf16> to vector<8x4xbf16>
    %65 = arith.truncf %62 : vector<4x256xf32> to vector<4x256xbf16>
    %cst_41 = arith.constant dense<0.000000e+00> : vector<8x256xf32>
    %66 = tpu.matmul %64, %65, %cst_41 {dimension_numbers = #tpu.dot_dimension_numbers<[1], [0], [0], [1], [0, 0, 1, 1], [], []>} : vector<8x4xbf16>, vector<4x256xbf16>, vector<8x256xf32> -> vector<8x256xf32>
    %67 = arith.addf %57, %66 : vector<8x256xf32>
    %c240_i32 = arith.constant 240 : i32
    %68 = tpu.dynamic_rotate %1 by %c240_i32 dim 1 : vector<4x256xf32>, i32 -> vector<4x256xf32>
    %c7 = arith.constant 7 : index
    %c0_42 = arith.constant 0 : index
    %c0_43 = arith.constant 0 : index
    %69 = vector.load %arg3[%c7, %c0_42, %c0_43] : memref<9x1x256xf32, #tpu.memory_space<vmem>>, vector<1x1x256xf32>
    %70 = vector.shape_cast %69 : vector<1x1x256xf32> to vector<1x256xf32>
    %71 = vector.broadcast %70 : vector<1x256xf32> to vector<4x256xf32>
    %72 = arith.mulf %68, %71 : vector<4x256xf32>
    %c7_44 = arith.constant 7 : index
    %c0_45 = arith.constant 0 : index
    %c0_46 = arith.constant 0 : index
    %73 = vector.load %arg2[%c7_44, %c0_45, %c0_46] : memref<9x8x4xbf16, #tpu.memory_space<vmem>>, vector<1x8x4xbf16>
    %74 = vector.shape_cast %73 : vector<1x8x4xbf16> to vector<8x4xbf16>
    %75 = arith.truncf %72 : vector<4x256xf32> to vector<4x256xbf16>
    %cst_47 = arith.constant dense<0.000000e+00> : vector<8x256xf32>
    %76 = tpu.matmul %74, %75, %cst_47 {dimension_numbers = #tpu.dot_dimension_numbers<[1], [0], [0], [1], [0, 0, 1, 1], [], []>} : vector<8x4xbf16>, vector<4x256xbf16>, vector<8x256xf32> -> vector<8x256xf32>
    %77 = arith.addf %67, %76 : vector<8x256xf32>
    %c239_i32 = arith.constant 239 : i32
    %78 = tpu.dynamic_rotate %1 by %c239_i32 dim 1 : vector<4x256xf32>, i32 -> vector<4x256xf32>
    %c8 = arith.constant 8 : index
    %c0_48 = arith.constant 0 : index
    %c0_49 = arith.constant 0 : index
    %79 = vector.load %arg3[%c8, %c0_48, %c0_49] : memref<9x1x256xf32, #tpu.memory_space<vmem>>, vector<1x1x256xf32>
    %80 = vector.shape_cast %79 : vector<1x1x256xf32> to vector<1x256xf32>
    %81 = vector.broadcast %80 : vector<1x256xf32> to vector<4x256xf32>
    %82 = arith.mulf %78, %81 : vector<4x256xf32>
    %c8_50 = arith.constant 8 : index
    %c0_51 = arith.constant 0 : index
    %c0_52 = arith.constant 0 : index
    %83 = vector.load %arg2[%c8_50, %c0_51, %c0_52] : memref<9x8x4xbf16, #tpu.memory_space<vmem>>, vector<1x8x4xbf16>
    %84 = vector.shape_cast %83 : vector<1x8x4xbf16> to vector<8x4xbf16>
    %85 = arith.truncf %82 : vector<4x256xf32> to vector<4x256xbf16>
    %cst_53 = arith.constant dense<0.000000e+00> : vector<8x256xf32>
    %86 = tpu.matmul %84, %85, %cst_53 {dimension_numbers = #tpu.dot_dimension_numbers<[1], [0], [0], [1], [0, 0, 1, 1], [], []>} : vector<8x4xbf16>, vector<4x256xbf16>, vector<8x256xf32> -> vector<8x256xf32>
    %87 = arith.addf %77, %86 : vector<8x256xf32>
    %88 = arith.truncf %87 : vector<8x256xf32> to vector<8x256xbf16>
    %c0_54 = arith.constant 0 : index
    %c0_55 = arith.constant 0 : index
    %c0_56 = arith.constant 0 : index
    %89 = vector.load %arg4[%c0_54, %c0_55, %c0_56] : memref<1x8x256xbf16, #tpu.memory_space<vmem>>, vector<1x8x256xbf16>
    %90 = vector.shape_cast %89 : vector<1x8x256xbf16> to vector<8x256xbf16>
    %91 = vector.shape_cast %88 : vector<8x256xbf16> to vector<1x8x256xbf16>
    tpu.vector_store %arg4[%c0_54, %c0_55, %c0_56], %91 {strides = array<i32>} : memref<1x8x256xbf16, #tpu.memory_space<vmem>>, vector<1x8x256xbf16>,
    %cst_57 = arith.constant dense<0.000000e+00> : vector<8xf32>
    %92 = vector.multi_reduction <add>, %87, %cst_57 [1] : vector<8x256xf32> to vector<8xf32>
    %93 = vector.shape_cast %92 : vector<8xf32> to vector<8x1xf32>
    %c0_58 = arith.constant 0 : index
    %c0_59 = arith.constant 0 : index
    %c0_60 = arith.constant 0 : index
    %94 = vector.load %arg5[%c0_58, %c0_59, %c0_60] : memref<1x8x1xf32, #tpu.memory_space<vmem>>, vector<1x8x1xf32>
    %95 = vector.shape_cast %94 : vector<1x8x1xf32> to vector<8x1xf32>
    %96 = vector.shape_cast %93 : vector<8x1xf32> to vector<1x8x1xf32>
    tpu.vector_store %arg5[%c0_58, %c0_59, %c0_60], %96 {strides = array<i32>} : memref<1x8x1xf32, #tpu.memory_space<vmem>>, vector<1x8x1xf32>,
    %97 = arith.mulf %87, %87 : vector<8x256xf32>
    %cst_61 = arith.constant dense<0.000000e+00> : vector<8xf32>
    %98 = vector.multi_reduction <add>, %97, %cst_61 [1] : vector<8x256xf32> to vector<8xf32>
    %99 = vector.shape_cast %98 : vector<8xf32> to vector<8x1xf32>
    %c0_62 = arith.constant 0 : index
    %c0_63 = arith.constant 0 : index
    %c0_64 = arith.constant 0 : index
    %100 = vector.load %arg6[%c0_62, %c0_63, %c0_64] : memref<1x8x1xf32, #tpu.memory_space<vmem>>, vector<1x8x1xf32>
    %101 = vector.shape_cast %100 : vector<1x8x1xf32> to vector<8x1xf32>
    %102 = vector.shape_cast %99 : vector<8x1xf32> to vector<1x8x1xf32>
    tpu.vector_store %arg6[%c0_62, %c0_63, %c0_64], %102 {strides = array<i32>} : memref<1x8x1xf32, #tpu.memory_space<vmem>>, vector<1x8x1xf32>,
    return
  }
  func.func @transform_0(%arg0: i32) -> (i32, i32, i32) {
    %c0_i32 = arith.constant 0 : i32
    %c0_i32_0 = arith.constant 0 : i32
    %c0_i32_1 = arith.constant 0 : i32
    return %arg0, %c0_i32, %c0_i32_0 : i32, i32, i32
  }
  func.func @transform_1(%arg0: i32) -> (i32, i32, i32) {
    %c0_i32 = arith.constant 0 : i32
    %c0_i32_0 = arith.constant 0 : i32
    %c0_i32_1 = arith.constant 0 : i32
    %c0_i32_2 = arith.constant 0 : i32
    return %c0_i32, %c0_i32_0, %c0_i32_1 : i32, i32, i32
  }
  func.func @transform_2(%arg0: i32) -> (i32, i32, i32) {
    %c0_i32 = arith.constant 0 : i32
    %c0_i32_0 = arith.constant 0 : i32
    %c0_i32_1 = arith.constant 0 : i32
    %c0_i32_2 = arith.constant 0 : i32
    return %c0_i32, %c0_i32_0, %c0_i32_1 : i32, i32, i32
  }
  func.func @transform_3(%arg0: i32) -> (i32, i32, i32) {
    %c0_i32 = arith.constant 0 : i32
    %c0_i32_0 = arith.constant 0 : i32
    %c0_i32_1 = arith.constant 0 : i32
    return %arg0, %c0_i32, %c0_i32_0 : i32, i32, i32
  }
  func.func @transform_4(%arg0: i32) -> (i32, i32, i32) {
    %c0_i32 = arith.constant 0 : i32
    %c0_i32_0 = arith.constant 0 : i32
    %c0_i32_1 = arith.constant 0 : i32
    return %arg0, %c0_i32, %c0_i32_0 : i32, i32, i32
  }
  func.func @transform_5(%arg0: i32) -> (i32, i32, i32) {
    %c0_i32 = arith.constant 0 : i32
    %c0_i32_0 = arith.constant 0 : i32
    %c0_i32_1 = arith.constant 0 : i32
    return %arg0, %c0_i32, %c0_i32_0 : i32, i32, i32
  }
}

module attributes {stable_mosaic.version = 11 : i64} {
  func.func @kernel(%arg0: i32, %arg1: memref<1x8x256xbf16, #tpu.memory_space<vmem>>, %arg2: memref<8x1xf32, #tpu.memory_space<vmem>>, %arg3: memref<8x1xf32, #tpu.memory_space<vmem>>, %arg4: memref<256x64xf32, #tpu.memory_space<vmem>>, %arg5: memref<1x8x256xf32, #tpu.memory_space<vmem>>, %arg6: memref<1x8x64xf32, #tpu.memory_space<vmem>>) attributes {dimension_semantics = [#tpu.dimension_semantics<parallel>], iteration_bounds = array<i64: 2>, scalar_prefetch = 0 : i64, scratch_operands = 0 : i64, tpu.core_type = #tpu.core_type<tc>, window_params = [{transform_indices = @transform_0, window_bounds = array<i64: 1, 8, 256>}, {pipeline_mode = #tpu.pipeline_mode<synchronous>, transform_indices = @transform_1, window_bounds = array<i64: 8, 1>}, {pipeline_mode = #tpu.pipeline_mode<synchronous>, transform_indices = @transform_2, window_bounds = array<i64: 8, 1>}, {pipeline_mode = #tpu.pipeline_mode<synchronous>, transform_indices = @transform_3, window_bounds = array<i64: 256, 64>}, {transform_indices = @transform_4, window_bounds = array<i64: 1, 8, 256>}, {transform_indices = @transform_5, window_bounds = array<i64: 1, 8, 64>}]} {
    %c0 = arith.constant 0 : index
    %c0_0 = arith.constant 0 : index
    %c0_1 = arith.constant 0 : index
    %0 = vector.load %arg1[%c0, %c0_0, %c0_1] : memref<1x8x256xbf16, #tpu.memory_space<vmem>>, vector<1x8x256xbf16>
    %1 = vector.shape_cast %0 : vector<1x8x256xbf16> to vector<8x256xbf16>
    %2 = arith.extf %1 : vector<8x256xbf16> to vector<8x256xf32>
    %c0_2 = arith.constant 0 : index
    %c0_3 = arith.constant 0 : index
    %3 = vector.load %arg2[%c0_2, %c0_3] : memref<8x1xf32, #tpu.memory_space<vmem>>, vector<8x1xf32>
    %4 = vector.broadcast %3 : vector<8x1xf32> to vector<8x256xf32>
    %5 = arith.mulf %2, %4 : vector<8x256xf32>
    %c0_4 = arith.constant 0 : index
    %c0_5 = arith.constant 0 : index
    %6 = vector.load %arg3[%c0_4, %c0_5] : memref<8x1xf32, #tpu.memory_space<vmem>>, vector<8x1xf32>
    %7 = vector.broadcast %6 : vector<8x1xf32> to vector<8x256xf32>
    %8 = arith.addf %5, %7 : vector<8x256xf32>
    %cst = arith.constant 0.000000e+00 : f32
    %9 = vector.broadcast %cst : f32 to vector<8x256xf32>
    %10 = arith.maximumf %8, %9 : vector<8x256xf32>
    %c0_6 = arith.constant 0 : index
    %c0_7 = arith.constant 0 : index
    %c0_8 = arith.constant 0 : index
    %11 = vector.load %arg5[%c0_6, %c0_7, %c0_8] : memref<1x8x256xf32, #tpu.memory_space<vmem>>, vector<1x8x256xf32>
    %12 = vector.shape_cast %11 : vector<1x8x256xf32> to vector<8x256xf32>
    %13 = vector.shape_cast %10 : vector<8x256xf32> to vector<1x8x256xf32>
    tpu.vector_store %arg5[%c0_6, %c0_7, %c0_8], %13 {strides = array<i32>} : memref<1x8x256xf32, #tpu.memory_space<vmem>>, vector<1x8x256xf32>,
    %c255_i32 = arith.constant 255 : i32
    %14 = tpu.dynamic_rotate %10 by %c255_i32 dim 1 : vector<8x256xf32>, i32 -> vector<8x256xf32>
    %15 = arith.maximumf %10, %14 : vector<8x256xf32>
    %c240_i32 = arith.constant 240 : i32
    %16 = tpu.dynamic_rotate %15 by %c240_i32 dim 1 : vector<8x256xf32>, i32 -> vector<8x256xf32>
    %17 = arith.maximumf %15, %16 : vector<8x256xf32>
    %c0_9 = arith.constant 0 : index
    %c0_10 = arith.constant 0 : index
    %18 = vector.load %arg4[%c0_9, %c0_10] : memref<256x64xf32, #tpu.memory_space<vmem>>, vector<256x64xf32>
    %cst_11 = arith.constant dense<0.000000e+00> : vector<8x64xf32>
    %19 = tpu.matmul %17, %18, %cst_11 {dimension_numbers = #tpu.dot_dimension_numbers<[1], [0], [0], [1], [0, 0, 1, 1], [], []>} : vector<8x256xf32>, vector<256x64xf32>, vector<8x64xf32> -> vector<8x64xf32>
    %c0_12 = arith.constant 0 : index
    %c0_13 = arith.constant 0 : index
    %c0_14 = arith.constant 0 : index
    %20 = vector.load %arg6[%c0_12, %c0_13, %c0_14] : memref<1x8x64xf32, #tpu.memory_space<vmem>>, vector<1x8x64xf32>
    %21 = vector.shape_cast %20 : vector<1x8x64xf32> to vector<8x64xf32>
    %22 = vector.shape_cast %19 : vector<8x64xf32> to vector<1x8x64xf32>
    tpu.vector_store %arg6[%c0_12, %c0_13, %c0_14], %22 {strides = array<i32>} : memref<1x8x64xf32, #tpu.memory_space<vmem>>, vector<1x8x64xf32>,
    return
  }
  func.func @transform_0(%arg0: i32) -> (i32, i32, i32) {
    %c0_i32 = arith.constant 0 : i32
    %c0_i32_0 = arith.constant 0 : i32
    %c0_i32_1 = arith.constant 0 : i32
    return %arg0, %c0_i32, %c0_i32_0 : i32, i32, i32
  }
  func.func @transform_1(%arg0: i32) -> (i32, i32) {
    %c0_i32 = arith.constant 0 : i32
    %c0_i32_0 = arith.constant 0 : i32
    %c0_i32_1 = arith.constant 0 : i32
    return %c0_i32, %c0_i32_0 : i32, i32
  }
  func.func @transform_2(%arg0: i32) -> (i32, i32) {
    %c0_i32 = arith.constant 0 : i32
    %c0_i32_0 = arith.constant 0 : i32
    %c0_i32_1 = arith.constant 0 : i32
    return %c0_i32, %c0_i32_0 : i32, i32
  }
  func.func @transform_3(%arg0: i32) -> (i32, i32) {
    %c0_i32 = arith.constant 0 : i32
    %c0_i32_0 = arith.constant 0 : i32
    %c0_i32_1 = arith.constant 0 : i32
    return %c0_i32, %c0_i32_0 : i32, i32
  }
  func.func @transform_4(%arg0: i32) -> (i32, i32, i32) {
    %c0_i32 = arith.constant 0 : i32
    %c0_i32_0 = arith.constant 0 : i32
    %c0_i32_1 = arith.constant 0 : i32
    return %arg0, %c0_i32, %c0_i32_0 : i32, i32, i32
  }
  func.func @transform_5(%arg0: i32) -> (i32, i32, i32) {
    %c0_i32 = arith.constant 0 : i32
    %c0_i32_0 = arith.constant 0 : i32
    %c0_i32_1 = arith.constant 0 : i32
    return %arg0, %c0_i32, %c0_i32_0 : i32, i32, i32
  }
}

module attributes {stable_mosaic.version = 11 : i64} {
  func.func @kernel(%arg0: i32, %arg1: memref<1x8x256xbf16, #tpu.memory_space<vmem>>, %arg2: memref<8x1xf32, #tpu.memory_space<vmem>>, %arg3: memref<8x1xf32, #tpu.memory_space<vmem>>, %arg4: memref<9x8x8xbf16, #tpu.memory_space<vmem>>, %arg5: memref<9x1x256xf32, #tpu.memory_space<vmem>>, %arg6: memref<1x8x256xbf16, #tpu.memory_space<vmem>>, %arg7: memref<1x8x1xf32, #tpu.memory_space<vmem>>, %arg8: memref<1x8x1xf32, #tpu.memory_space<vmem>>) attributes {dimension_semantics = [#tpu.dimension_semantics<parallel>], iteration_bounds = array<i64: 2>, scalar_prefetch = 0 : i64, scratch_operands = 0 : i64, tpu.core_type = #tpu.core_type<tc>, window_params = [{transform_indices = @transform_0, window_bounds = array<i64: 1, 8, 256>}, {pipeline_mode = #tpu.pipeline_mode<synchronous>, transform_indices = @transform_1, window_bounds = array<i64: 8, 1>}, {pipeline_mode = #tpu.pipeline_mode<synchronous>, transform_indices = @transform_2, window_bounds = array<i64: 8, 1>}, {pipeline_mode = #tpu.pipeline_mode<synchronous>, transform_indices = @transform_3, window_bounds = array<i64: 9, 8, 8>}, {pipeline_mode = #tpu.pipeline_mode<synchronous>, transform_indices = @transform_4, window_bounds = array<i64: 9, 1, 256>}, {transform_indices = @transform_5, window_bounds = array<i64: 1, 8, 256>}, {transform_indices = @transform_6, window_bounds = array<i64: 1, 8, 1>}, {transform_indices = @transform_7, window_bounds = array<i64: 1, 8, 1>}]} {
    %c0 = arith.constant 0 : index
    %c0_0 = arith.constant 0 : index
    %c0_1 = arith.constant 0 : index
    %0 = vector.load %arg1[%c0, %c0_0, %c0_1] : memref<1x8x256xbf16, #tpu.memory_space<vmem>>, vector<1x8x256xbf16>
    %1 = vector.shape_cast %0 : vector<1x8x256xbf16> to vector<8x256xbf16>
    %2 = arith.extf %1 : vector<8x256xbf16> to vector<8x256xf32>
    %c0_2 = arith.constant 0 : index
    %c0_3 = arith.constant 0 : index
    %3 = vector.load %arg2[%c0_2, %c0_3] : memref<8x1xf32, #tpu.memory_space<vmem>>, vector<8x1xf32>
    %4 = vector.broadcast %3 : vector<8x1xf32> to vector<8x256xf32>
    %5 = arith.mulf %2, %4 : vector<8x256xf32>
    %c0_4 = arith.constant 0 : index
    %c0_5 = arith.constant 0 : index
    %6 = vector.load %arg3[%c0_4, %c0_5] : memref<8x1xf32, #tpu.memory_space<vmem>>, vector<8x1xf32>
    %7 = vector.broadcast %6 : vector<8x1xf32> to vector<8x256xf32>
    %8 = arith.addf %5, %7 : vector<8x256xf32>
    %cst = arith.constant 0.000000e+00 : f32
    %9 = vector.broadcast %cst : f32 to vector<8x256xf32>
    %10 = arith.maximumf %8, %9 : vector<8x256xf32>
    %cst_6 = arith.constant 0.000000e+00 : f32
    %11 = vector.broadcast %cst_6 : f32 to vector<8x256xf32>
    %c17_i32 = arith.constant 17 : i32
    %12 = tpu.dynamic_rotate %10 by %c17_i32 dim 1 : vector<8x256xf32>, i32 -> vector<8x256xf32>
    %c0_7 = arith.constant 0 : index
    %c0_8 = arith.constant 0 : index
    %c0_9 = arith.constant 0 : index
    %13 = vector.load %arg5[%c0_7, %c0_8, %c0_9] : memref<9x1x256xf32, #tpu.memory_space<vmem>>, vector<1x1x256xf32>
    %14 = vector.shape_cast %13 : vector<1x1x256xf32> to vector<1x256xf32>
    %15 = vector.broadcast %14 : vector<1x256xf32> to vector<8x256xf32>
    %16 = arith.mulf %12, %15 : vector<8x256xf32>
    %c0_10 = arith.constant 0 : index
    %c0_11 = arith.constant 0 : index
    %c0_12 = arith.constant 0 : index
    %17 = vector.load %arg4[%c0_10, %c0_11, %c0_12] : memref<9x8x8xbf16, #tpu.memory_space<vmem>>, vector<1x8x8xbf16>
    %18 = vector.shape_cast %17 : vector<1x8x8xbf16> to vector<8x8xbf16>
    %19 = arith.truncf %16 : vector<8x256xf32> to vector<8x256xbf16>
    %cst_13 = arith.constant dense<0.000000e+00> : vector<8x256xf32>
    %20 = tpu.matmul %18, %19, %cst_13 {dimension_numbers = #tpu.dot_dimension_numbers<[1], [0], [0], [1], [0, 0, 1, 1], [], []>} : vector<8x8xbf16>, vector<8x256xbf16>, vector<8x256xf32> -> vector<8x256xf32>
    %21 = arith.addf %11, %20 : vector<8x256xf32>
    %c16_i32 = arith.constant 16 : i32
    %22 = tpu.dynamic_rotate %10 by %c16_i32 dim 1 : vector<8x256xf32>, i32 -> vector<8x256xf32>
    %c1 = arith.constant 1 : index
    %c0_14 = arith.constant 0 : index
    %c0_15 = arith.constant 0 : index
    %23 = vector.load %arg5[%c1, %c0_14, %c0_15] : memref<9x1x256xf32, #tpu.memory_space<vmem>>, vector<1x1x256xf32>
    %24 = vector.shape_cast %23 : vector<1x1x256xf32> to vector<1x256xf32>
    %25 = vector.broadcast %24 : vector<1x256xf32> to vector<8x256xf32>
    %26 = arith.mulf %22, %25 : vector<8x256xf32>
    %c1_16 = arith.constant 1 : index
    %c0_17 = arith.constant 0 : index
    %c0_18 = arith.constant 0 : index
    %27 = vector.load %arg4[%c1_16, %c0_17, %c0_18] : memref<9x8x8xbf16, #tpu.memory_space<vmem>>, vector<1x8x8xbf16>
    %28 = vector.shape_cast %27 : vector<1x8x8xbf16> to vector<8x8xbf16>
    %29 = arith.truncf %26 : vector<8x256xf32> to vector<8x256xbf16>
    %cst_19 = arith.constant dense<0.000000e+00> : vector<8x256xf32>
    %30 = tpu.matmul %28, %29, %cst_19 {dimension_numbers = #tpu.dot_dimension_numbers<[1], [0], [0], [1], [0, 0, 1, 1], [], []>} : vector<8x8xbf16>, vector<8x256xbf16>, vector<8x256xf32> -> vector<8x256xf32>
    %31 = arith.addf %21, %30 : vector<8x256xf32>
    %c15_i32 = arith.constant 15 : i32
    %32 = tpu.dynamic_rotate %10 by %c15_i32 dim 1 : vector<8x256xf32>, i32 -> vector<8x256xf32>
    %c2 = arith.constant 2 : index
    %c0_20 = arith.constant 0 : index
    %c0_21 = arith.constant 0 : index
    %33 = vector.load %arg5[%c2, %c0_20, %c0_21] : memref<9x1x256xf32, #tpu.memory_space<vmem>>, vector<1x1x256xf32>
    %34 = vector.shape_cast %33 : vector<1x1x256xf32> to vector<1x256xf32>
    %35 = vector.broadcast %34 : vector<1x256xf32> to vector<8x256xf32>
    %36 = arith.mulf %32, %35 : vector<8x256xf32>
    %c2_22 = arith.constant 2 : index
    %c0_23 = arith.constant 0 : index
    %c0_24 = arith.constant 0 : index
    %37 = vector.load %arg4[%c2_22, %c0_23, %c0_24] : memref<9x8x8xbf16, #tpu.memory_space<vmem>>, vector<1x8x8xbf16>
    %38 = vector.shape_cast %37 : vector<1x8x8xbf16> to vector<8x8xbf16>
    %39 = arith.truncf %36 : vector<8x256xf32> to vector<8x256xbf16>
    %cst_25 = arith.constant dense<0.000000e+00> : vector<8x256xf32>
    %40 = tpu.matmul %38, %39, %cst_25 {dimension_numbers = #tpu.dot_dimension_numbers<[1], [0], [0], [1], [0, 0, 1, 1], [], []>} : vector<8x8xbf16>, vector<8x256xbf16>, vector<8x256xf32> -> vector<8x256xf32>
    %41 = arith.addf %31, %40 : vector<8x256xf32>
    %c1_i32 = arith.constant 1 : i32
    %42 = tpu.dynamic_rotate %10 by %c1_i32 dim 1 : vector<8x256xf32>, i32 -> vector<8x256xf32>
    %c3 = arith.constant 3 : index
    %c0_26 = arith.constant 0 : index
    %c0_27 = arith.constant 0 : index
    %43 = vector.load %arg5[%c3, %c0_26, %c0_27] : memref<9x1x256xf32, #tpu.memory_space<vmem>>, vector<1x1x256xf32>
    %44 = vector.shape_cast %43 : vector<1x1x256xf32> to vector<1x256xf32>
    %45 = vector.broadcast %44 : vector<1x256xf32> to vector<8x256xf32>
    %46 = arith.mulf %42, %45 : vector<8x256xf32>
    %c3_28 = arith.constant 3 : index
    %c0_29 = arith.constant 0 : index
    %c0_30 = arith.constant 0 : index
    %47 = vector.load %arg4[%c3_28, %c0_29, %c0_30] : memref<9x8x8xbf16, #tpu.memory_space<vmem>>, vector<1x8x8xbf16>
    %48 = vector.shape_cast %47 : vector<1x8x8xbf16> to vector<8x8xbf16>
    %49 = arith.truncf %46 : vector<8x256xf32> to vector<8x256xbf16>
    %cst_31 = arith.constant dense<0.000000e+00> : vector<8x256xf32>
    %50 = tpu.matmul %48, %49, %cst_31 {dimension_numbers = #tpu.dot_dimension_numbers<[1], [0], [0], [1], [0, 0, 1, 1], [], []>} : vector<8x8xbf16>, vector<8x256xbf16>, vector<8x256xf32> -> vector<8x256xf32>
    %51 = arith.addf %41, %50 : vector<8x256xf32>
    %c4 = arith.constant 4 : index
    %c0_32 = arith.constant 0 : index
    %c0_33 = arith.constant 0 : index
    %52 = vector.load %arg4[%c4, %c0_32, %c0_33] : memref<9x8x8xbf16, #tpu.memory_space<vmem>>, vector<1x8x8xbf16>
    %53 = vector.shape_cast %52 : vector<1x8x8xbf16> to vector<8x8xbf16>
    %54 = arith.truncf %10 : vector<8x256xf32> to vector<8x256xbf16>
    %cst_34 = arith.constant dense<0.000000e+00> : vector<8x256xf32>
    %55 = tpu.matmul %53, %54, %cst_34 {dimension_numbers = #tpu.dot_dimension_numbers<[1], [0], [0], [1], [0, 0, 1, 1], [], []>} : vector<8x8xbf16>, vector<8x256xbf16>, vector<8x256xf32> -> vector<8x256xf32>
    %56 = arith.addf %51, %55 : vector<8x256xf32>
    %c255_i32 = arith.constant 255 : i32
    %57 = tpu.dynamic_rotate %10 by %c255_i32 dim 1 : vector<8x256xf32>, i32 -> vector<8x256xf32>
    %c5 = arith.constant 5 : index
    %c0_35 = arith.constant 0 : index
    %c0_36 = arith.constant 0 : index
    %58 = vector.load %arg5[%c5, %c0_35, %c0_36] : memref<9x1x256xf32, #tpu.memory_space<vmem>>, vector<1x1x256xf32>
    %59 = vector.shape_cast %58 : vector<1x1x256xf32> to vector<1x256xf32>
    %60 = vector.broadcast %59 : vector<1x256xf32> to vector<8x256xf32>
    %61 = arith.mulf %57, %60 : vector<8x256xf32>
    %c5_37 = arith.constant 5 : index
    %c0_38 = arith.constant 0 : index
    %c0_39 = arith.constant 0 : index
    %62 = vector.load %arg4[%c5_37, %c0_38, %c0_39] : memref<9x8x8xbf16, #tpu.memory_space<vmem>>, vector<1x8x8xbf16>
    %63 = vector.shape_cast %62 : vector<1x8x8xbf16> to vector<8x8xbf16>
    %64 = arith.truncf %61 : vector<8x256xf32> to vector<8x256xbf16>
    %cst_40 = arith.constant dense<0.000000e+00> : vector<8x256xf32>
    %65 = tpu.matmul %63, %64, %cst_40 {dimension_numbers = #tpu.dot_dimension_numbers<[1], [0], [0], [1], [0, 0, 1, 1], [], []>} : vector<8x8xbf16>, vector<8x256xbf16>, vector<8x256xf32> -> vector<8x256xf32>
    %66 = arith.addf %56, %65 : vector<8x256xf32>
    %c241_i32 = arith.constant 241 : i32
    %67 = tpu.dynamic_rotate %10 by %c241_i32 dim 1 : vector<8x256xf32>, i32 -> vector<8x256xf32>
    %c6 = arith.constant 6 : index
    %c0_41 = arith.constant 0 : index
    %c0_42 = arith.constant 0 : index
    %68 = vector.load %arg5[%c6, %c0_41, %c0_42] : memref<9x1x256xf32, #tpu.memory_space<vmem>>, vector<1x1x256xf32>
    %69 = vector.shape_cast %68 : vector<1x1x256xf32> to vector<1x256xf32>
    %70 = vector.broadcast %69 : vector<1x256xf32> to vector<8x256xf32>
    %71 = arith.mulf %67, %70 : vector<8x256xf32>
    %c6_43 = arith.constant 6 : index
    %c0_44 = arith.constant 0 : index
    %c0_45 = arith.constant 0 : index
    %72 = vector.load %arg4[%c6_43, %c0_44, %c0_45] : memref<9x8x8xbf16, #tpu.memory_space<vmem>>, vector<1x8x8xbf16>
    %73 = vector.shape_cast %72 : vector<1x8x8xbf16> to vector<8x8xbf16>
    %74 = arith.truncf %71 : vector<8x256xf32> to vector<8x256xbf16>
    %cst_46 = arith.constant dense<0.000000e+00> : vector<8x256xf32>
    %75 = tpu.matmul %73, %74, %cst_46 {dimension_numbers = #tpu.dot_dimension_numbers<[1], [0], [0], [1], [0, 0, 1, 1], [], []>} : vector<8x8xbf16>, vector<8x256xbf16>, vector<8x256xf32> -> vector<8x256xf32>
    %76 = arith.addf %66, %75 : vector<8x256xf32>
    %c240_i32 = arith.constant 240 : i32
    %77 = tpu.dynamic_rotate %10 by %c240_i32 dim 1 : vector<8x256xf32>, i32 -> vector<8x256xf32>
    %c7 = arith.constant 7 : index
    %c0_47 = arith.constant 0 : index
    %c0_48 = arith.constant 0 : index
    %78 = vector.load %arg5[%c7, %c0_47, %c0_48] : memref<9x1x256xf32, #tpu.memory_space<vmem>>, vector<1x1x256xf32>
    %79 = vector.shape_cast %78 : vector<1x1x256xf32> to vector<1x256xf32>
    %80 = vector.broadcast %79 : vector<1x256xf32> to vector<8x256xf32>
    %81 = arith.mulf %77, %80 : vector<8x256xf32>
    %c7_49 = arith.constant 7 : index
    %c0_50 = arith.constant 0 : index
    %c0_51 = arith.constant 0 : index
    %82 = vector.load %arg4[%c7_49, %c0_50, %c0_51] : memref<9x8x8xbf16, #tpu.memory_space<vmem>>, vector<1x8x8xbf16>
    %83 = vector.shape_cast %82 : vector<1x8x8xbf16> to vector<8x8xbf16>
    %84 = arith.truncf %81 : vector<8x256xf32> to vector<8x256xbf16>
    %cst_52 = arith.constant dense<0.000000e+00> : vector<8x256xf32>
    %85 = tpu.matmul %83, %84, %cst_52 {dimension_numbers = #tpu.dot_dimension_numbers<[1], [0], [0], [1], [0, 0, 1, 1], [], []>} : vector<8x8xbf16>, vector<8x256xbf16>, vector<8x256xf32> -> vector<8x256xf32>
    %86 = arith.addf %76, %85 : vector<8x256xf32>
    %c239_i32 = arith.constant 239 : i32
    %87 = tpu.dynamic_rotate %10 by %c239_i32 dim 1 : vector<8x256xf32>, i32 -> vector<8x256xf32>
    %c8 = arith.constant 8 : index
    %c0_53 = arith.constant 0 : index
    %c0_54 = arith.constant 0 : index
    %88 = vector.load %arg5[%c8, %c0_53, %c0_54] : memref<9x1x256xf32, #tpu.memory_space<vmem>>, vector<1x1x256xf32>
    %89 = vector.shape_cast %88 : vector<1x1x256xf32> to vector<1x256xf32>
    %90 = vector.broadcast %89 : vector<1x256xf32> to vector<8x256xf32>
    %91 = arith.mulf %87, %90 : vector<8x256xf32>
    %c8_55 = arith.constant 8 : index
    %c0_56 = arith.constant 0 : index
    %c0_57 = arith.constant 0 : index
    %92 = vector.load %arg4[%c8_55, %c0_56, %c0_57] : memref<9x8x8xbf16, #tpu.memory_space<vmem>>, vector<1x8x8xbf16>
    %93 = vector.shape_cast %92 : vector<1x8x8xbf16> to vector<8x8xbf16>
    %94 = arith.truncf %91 : vector<8x256xf32> to vector<8x256xbf16>
    %cst_58 = arith.constant dense<0.000000e+00> : vector<8x256xf32>
    %95 = tpu.matmul %93, %94, %cst_58 {dimension_numbers = #tpu.dot_dimension_numbers<[1], [0], [0], [1], [0, 0, 1, 1], [], []>} : vector<8x8xbf16>, vector<8x256xbf16>, vector<8x256xf32> -> vector<8x256xf32>
    %96 = arith.addf %86, %95 : vector<8x256xf32>
    %97 = arith.truncf %96 : vector<8x256xf32> to vector<8x256xbf16>
    %c0_59 = arith.constant 0 : index
    %c0_60 = arith.constant 0 : index
    %c0_61 = arith.constant 0 : index
    %98 = vector.load %arg6[%c0_59, %c0_60, %c0_61] : memref<1x8x256xbf16, #tpu.memory_space<vmem>>, vector<1x8x256xbf16>
    %99 = vector.shape_cast %98 : vector<1x8x256xbf16> to vector<8x256xbf16>
    %100 = vector.shape_cast %97 : vector<8x256xbf16> to vector<1x8x256xbf16>
    tpu.vector_store %arg6[%c0_59, %c0_60, %c0_61], %100 {strides = array<i32>} : memref<1x8x256xbf16, #tpu.memory_space<vmem>>, vector<1x8x256xbf16>,
    %cst_62 = arith.constant dense<0.000000e+00> : vector<8xf32>
    %101 = vector.multi_reduction <add>, %96, %cst_62 [1] : vector<8x256xf32> to vector<8xf32>
    %102 = vector.shape_cast %101 : vector<8xf32> to vector<8x1xf32>
    %c0_63 = arith.constant 0 : index
    %c0_64 = arith.constant 0 : index
    %c0_65 = arith.constant 0 : index
    %103 = vector.load %arg7[%c0_63, %c0_64, %c0_65] : memref<1x8x1xf32, #tpu.memory_space<vmem>>, vector<1x8x1xf32>
    %104 = vector.shape_cast %103 : vector<1x8x1xf32> to vector<8x1xf32>
    %105 = vector.shape_cast %102 : vector<8x1xf32> to vector<1x8x1xf32>
    tpu.vector_store %arg7[%c0_63, %c0_64, %c0_65], %105 {strides = array<i32>} : memref<1x8x1xf32, #tpu.memory_space<vmem>>, vector<1x8x1xf32>,
    %106 = arith.mulf %96, %96 : vector<8x256xf32>
    %cst_66 = arith.constant dense<0.000000e+00> : vector<8xf32>
    %107 = vector.multi_reduction <add>, %106, %cst_66 [1] : vector<8x256xf32> to vector<8xf32>
    %108 = vector.shape_cast %107 : vector<8xf32> to vector<8x1xf32>
    %c0_67 = arith.constant 0 : index
    %c0_68 = arith.constant 0 : index
    %c0_69 = arith.constant 0 : index
    %109 = vector.load %arg8[%c0_67, %c0_68, %c0_69] : memref<1x8x1xf32, #tpu.memory_space<vmem>>, vector<1x8x1xf32>
    %110 = vector.shape_cast %109 : vector<1x8x1xf32> to vector<8x1xf32>
    %111 = vector.shape_cast %108 : vector<8x1xf32> to vector<1x8x1xf32>
    tpu.vector_store %arg8[%c0_67, %c0_68, %c0_69], %111 {strides = array<i32>} : memref<1x8x1xf32, #tpu.memory_space<vmem>>, vector<1x8x1xf32>,
    return
  }
  func.func @transform_0(%arg0: i32) -> (i32, i32, i32) {
    %c0_i32 = arith.constant 0 : i32
    %c0_i32_0 = arith.constant 0 : i32
    %c0_i32_1 = arith.constant 0 : i32
    return %arg0, %c0_i32, %c0_i32_0 : i32, i32, i32
  }
  func.func @transform_1(%arg0: i32) -> (i32, i32) {
    %c0_i32 = arith.constant 0 : i32
    %c0_i32_0 = arith.constant 0 : i32
    %c0_i32_1 = arith.constant 0 : i32
    return %c0_i32, %c0_i32_0 : i32, i32
  }
  func.func @transform_2(%arg0: i32) -> (i32, i32) {
    %c0_i32 = arith.constant 0 : i32
    %c0_i32_0 = arith.constant 0 : i32
    %c0_i32_1 = arith.constant 0 : i32
    return %c0_i32, %c0_i32_0 : i32, i32
  }
  func.func @transform_3(%arg0: i32) -> (i32, i32, i32) {
    %c0_i32 = arith.constant 0 : i32
    %c0_i32_0 = arith.constant 0 : i32
    %c0_i32_1 = arith.constant 0 : i32
    %c0_i32_2 = arith.constant 0 : i32
    return %c0_i32, %c0_i32_0, %c0_i32_1 : i32, i32, i32
  }
  func.func @transform_4(%arg0: i32) -> (i32, i32, i32) {
    %c0_i32 = arith.constant 0 : i32
    %c0_i32_0 = arith.constant 0 : i32
    %c0_i32_1 = arith.constant 0 : i32
    %c0_i32_2 = arith.constant 0 : i32
    return %c0_i32, %c0_i32_0, %c0_i32_1 : i32, i32, i32
  }
  func.func @transform_5(%arg0: i32) -> (i32, i32, i32) {
    %c0_i32 = arith.constant 0 : i32
    %c0_i32_0 = arith.constant 0 : i32
    %c0_i32_1 = arith.constant 0 : i32
    return %arg0, %c0_i32, %c0_i32_0 : i32, i32, i32
  }
  func.func @transform_6(%arg0: i32) -> (i32, i32, i32) {
    %c0_i32 = arith.constant 0 : i32
    %c0_i32_0 = arith.constant 0 : i32
    %c0_i32_1 = arith.constant 0 : i32
    return %arg0, %c0_i32, %c0_i32_0 : i32, i32, i32
  }
  func.func @transform_7(%arg0: i32) -> (i32, i32, i32) {
    %c0_i32 = arith.constant 0 : i32
    %c0_i32_0 = arith.constant 0 : i32
    %c0_i32_1 = arith.constant 0 : i32
    return %arg0, %c0_i32, %c0_i32_0 : i32, i32, i32
  }
}

</mosaic_0001>

<bundles_post_ra>
// kernel: contract_block_forward.5
= control target key start
LH: loop header
LB: loop body
LE: loop exit
PB: predicated region body
PF: predicated region fallthrough
CT: control target
= control target key end

     0   :  { %11 = vsyncpa [#allocation3], 0  ;;  %s597_s18 = smov 0   ;;  %s644_s0 = inlined_call_operand.vmem [shape: bf16[2,8,256], index: 0, kind: input, shape index: {}]   ;;  %s645_s1 = inlined_call_operand.vmem [shape: f32[8,1], index: 1, kind: input, shape index: {}]   ;;  %s646_s2 = inlined_call_operand.vmem [shape: f32[8,1], index: 2, kind: input, shape index: {}]   ;;  %s647_s3 = inlined_call_operand.hbm [shape: f32[256,64], index: 3, kind: input, shape index: {}]   ;;  %s648_s4 = inlined_call_operand.vmem [shape: f32[2,8,256], index: 4, kind: output, shape index: {0}]   ;;  %s649_s5 = inlined_call_operand.vmem [shape: f32[2,8,64], index: 5, kind: output, shape index: {1}]  }
   0x1 LB: > { %s180_s21 = sshll.u32 %s647_s3, 4  ;;  %s468_s22 = sadd.s32 4294967295, %s559_s18   ;;  %s559_s18 = sphi %s597_s18, %s17_s18   ;;  %s181_s21 = int_to_ptr.hbm [resolvable:$true] %s180_s21 }
   0x2   : > { %p470_p0 = scmp.ge.s32.totalorder %s559_s18, 1  ;;  %p163_p1 = scmp.lt.s32.totalorder %s559_s18, 3 }
   0x3   : > { %p492_p2 = scmp.eq.s32.totalorder %s468_s22, 0  ;;  %s561_s23 = smov [#allocation2]  }
   0x4   : > { %p164_p3 = pnand %p470_p0, %p163_p1  ;;  %s182_s24 = sshll.u32 %s561_s23, 4  ;;  %s183_s24 = int_to_ptr.vmem [resolvable:$true] %s182_s24 }
   0x5   : > { %s562_s25 = smov 128   ;;  %s563_s26 = smov 8  }
   0x6   : > { %p488_p4 = pneg %p164_p3  ;;  %206 = sbr.rel (%p164_p3) target bundleno = 514 (0x202), region = 36 }
   0x8   : > { %p489_p5 = pnand %p492_p2, %p488_p4 }
   0xa   : > { %491 = dma.hbm_to_vmem [thread:$0]  (!%p489_p5), %s181_s21, 4096, %s183_s24, [#allocation3], %s562_s25, %s562_s25, %s563_s26  }
   0xb   : > { %554 = dma.done.wait (%p492_p2), [#allocation3], 4096  }
   0xc   : > { %556 = vsyncadd (%p492_p2), [#allocation3], 4294963200  ;;  %v564_v0 = vmov 0   ;;  %v256_v1 = vld [vmem:[%s645_s1] sm:$0xff]  ;;  %p239_p6 = scmp.lt.s32.totalorder %s468_s22, 1  ;;  %s565_s14 = smov 127   ;;  %v280_v33 = vlaneseq }
   0xd   : > { %508 = vset.pattern.permute.xlu0 %v564_v0  ;;  %v264_v2 = vld [vmem:[%s646_s2] sm:$0xff]  ;;  %v311_v15 = vld [vmem:[#allocation2 + $0x78] sm:$0xff]  ;;  %v310_v17 = vld [vmem:[#allocation2 + $0x70] sm:$0xff]  ;;  %s566_s15 = smov 112   ;;  %vm368_vm2 = vcmask 523264  }
   0xe   : > { %259 = vperm.xlu0 %508, %v256_v1   ;;  %s651_s22 = smov (!%p239_p6, %s468_s22), 1  ;;  %v327_v16 = vld [vmem:[#allocation2 + $0xf8] sm:$0xff]  ;;  %328 = vmatpush.msra.mxu0 %v311_v15  ;;  %v326_v18 = vld [vmem:[#allocation2 + $0xf0] sm:$0xff]  ;;  %v309_v19 = vld [vmem:[#allocation2 + $0x68] sm:$0xff]  ;;  %v281_v38 = vand.u32 127, %v280_v33 }
   0xf   : > { %s482_s6 = sshll.u32 %s651_s22, 3  ;;  %s483_s10 = sshll.u32 %s651_s22, 4  ;;  %348 = vmatpush.msra.mxu1 %v327_v16  ;;  %v325_v20 = vld [vmem:[#allocation2 + $0xe8] sm:$0xff]  ;;  %v308_v21 = vld [vmem:[#allocation2 + $0x60] sm:$0xff]  ;;  %v307_v23 = vld [vmem:[#allocation2 + $0x58] sm:$0xff] }
  0x10   : > { %s243_s9 = scalar_lea.vmem %s644_s0, %s482_s6  ;;  %s248_s13 = scalar_lea.vmem %s648_s4, %s483_s10  ;;  %329 = vmatpush.msra.mxu0 %v310_v17  ;;  %v324_v22 = vld [vmem:[#allocation2 + $0xe0] sm:$0xff]  ;;  %v323_v24 = vld [vmem:[#allocation2 + $0xd8] sm:$0xff]  ;;  %v306_v25 = vld [vmem:[#allocation2 + $0x50] sm:$0xff]  ;;  %vm282_vm0 = vcmp.lt.s32.totalorder %v281_v38, 127  ;;  %vm291_vm1 = vcmp.lt.s32.totalorder %v281_v38, 112 }
  0x11   : > { %v253_v4 = vld [vmem:[%s243_s9] sm:$0xff]  ;;  %349 = vmatpush.msra.mxu1 %v326_v18  ;;  %v322_v26 = vld [vmem:[#allocation2 + $0xd0] sm:$0xff]  ;;  %v305_v27 = vld [vmem:[#allocation2 + $0x48] sm:$0xff]  ;;  %s252_s19 = scalar_lea.vmem %s649_s5, %s482_s6 }
  0x12   : > { %v254_v5 = vunpack.c.l.bf16 %v253_v4  ;;  %v255_v6 = vunpack.c.h.bf16 %v253_v4  ;;  %330 = vmatpush.msra.mxu0 %v309_v19  ;;  %v321_v28 = vld [vmem:[#allocation2 + $0xc8] sm:$0xff]  ;;  %v304_v29 = vld [vmem:[#allocation2 + $0x40] sm:$0xff]  ;;  %v303_v31 = vld [vmem:[#allocation2 + $0x38] sm:$0xff] }
  0x13   : > { %350 = vmatpush.msra.mxu1 %v325_v20  ;;  %v320_v30 = vld [vmem:[#allocation2 + $0xc0] sm:$0xff]  ;;  %v319_v32 = vld [vmem:[#allocation2 + $0xb8] sm:$0xff]  ;;  %v302_v34 = vld [vmem:[#allocation2 + $0x30] sm:$0xff] }
  0x14   : > { %331 = vmatpush.msra.mxu0 %v308_v21  ;;  %v318_v35 = vld [vmem:[#allocation2 + $0xb0] sm:$0xff]  ;;  %v301_v36 = vld [vmem:[#allocation2 + $0x28] sm:$0xff]  ;;  %v300_v39 = vld [vmem:[#allocation2 + $0x20] sm:$0xff] }
  0x15   : > { %351 = vmatpush.msra.mxu1 %v324_v22  ;;  %v317_v37 = vld [vmem:[#allocation2 + $0xa8] sm:$0xff]  ;;  %v316_v40 = vld [vmem:[#allocation2 + $0xa0] sm:$0xff]  ;;  %v299_v41 = vld [vmem:[#allocation2 + $0x18] sm:$0xff] }
  0x16   : > { %267 = vperm.xlu0 %508, %v264_v2   ;;  %332 = vmatpush.msra.mxu0 %v307_v23  ;;  %v315_v42 = vld [vmem:[#allocation2 + $0x98] sm:$0xff]  ;;  %v298_v51 = vld [vmem:[#allocation2 + $0x10] sm:$0xff]  ;;  %v297_v53 = vld [vmem:[#allocation2 + $0x8] sm:$0xff] }
  0x17   : > { %352 = vmatpush.msra.mxu1 %v323_v24  ;;  %v314_v52 = vld [vmem:[#allocation2 + $0x90] sm:$0xff]  ;;  %v313_v54 = vld [vmem:[#allocation2 + $0x88] sm:$0xff]  ;;  %v296_v55 = vld [vmem:[#allocation2] sm:$0xff] }
  0x18   : > { %333 = vmatpush.msra.mxu0 %v306_v25  ;;  %v312_v56 = vld [vmem:[#allocation2 + $0x80] sm:$0xff] }
  0x19   : > { %353 = vmatpush.msra.mxu1 %v322_v26 }
  0x1a   : > { %334 = vmatpush.msra.mxu0 %v305_v27 }
  0x1b   : > { %354 = vmatpush.msra.mxu1 %v321_v28 }
  0x1c   : > { %335 = vmatpush.msra.mxu0 %v304_v29 }
  0x1d   : > { %355 = vmatpush.msra.mxu1 %v320_v30 }
  0x1e   : > { %336 = vmatpush.msra.mxu0 %v303_v31 }
  0x1f   : > { %356 = vmatpush.msra.mxu1 %v319_v32 }
  0x20   : > { %337 = vmatpush.msra.mxu0 %v302_v34 }
  0x21   : > { %357 = vmatpush.msra.mxu1 %v318_v35 }
  0x22   : > { %338 = vmatpush.msra.mxu0 %v301_v36 }
  0x23   : > { %358 = vmatpush.msra.mxu1 %v317_v37 }
  0x24   : > { %339 = vmatpush.msra.mxu0 %v300_v39 }
  0x25   : > { %359 = vmatpush.msra.mxu1 %v316_v40 }
  0x26   : > { %340 = vmatpush.msra.mxu0 %v299_v41 }
  0x27   : > { %360 = vmatpush.msra.mxu1 %v315_v42 }
  0x28   : > { %341 = vmatpush.msra.mxu0 %v298_v51 }
  0x29   : > { %361 = vmatpush.msra.mxu1 %v314_v52 }
  0x2a   : > { %342 = vmatpush.msra.mxu0 %v297_v53 }
  0x2b   : > { %362 = vmatpush.msra.mxu1 %v313_v54 }
  0x2c   : > { %343 = vmatpush.msra.mxu0 %v296_v55 }
  0x2d   : > { %363 = vmatpush.msra.mxu1 %v312_v56 }
  0x80   : > { %v260_v3 = vpop.permute.xlu0 %259 }
  0x81   : > { %v262_v7 = vmul.f32 %v260_v3, %v254_v5  ;;  %v263_v8 = vmul.f32 %v260_v3, %v255_v6 }
  0x88   : > { %v268_v9 = vpop.permute.xlu0 %267 }
  0x89   : > { %v270_v10 = vadd.f32 %v268_v9, %v262_v7  ;;  %v271_v11 = vadd.f32 %v268_v9, %v263_v8 }
  0x8b   : > { %v626_v12 = vmax.f32 %v270_v10, 0.0  ;;  %v628_v13 = vmax.f32 %v271_v11, 0.0 }
  0x8d   : > { %274 = vst [vmem:[%s248_s13] sm:$0xff] %v626_v12  ;;  %v509_v14 = vpack.i.bf16 %v628_v13, %v626_v12 }
  0x8e   : > { %275 = vst [vmem:[%s248_s13 + $0x8] sm:$0xff] %v628_v13 }
  0x8f   : > { %510 = vrot.lane.b32.xlu1 %v509_v14, %s565_s14 }
 0x101   : > { %v511_v43 = vpop.permute.xlu1 %510 }
 0x102   : > { %v513_v44 = vunpack.i.h.bf16 %v511_v43  ;;  %v512_v45 = vunpack.i.l.bf16 %v511_v43 }
 0x104   : > { %v283_v46 = vsel %vm282_vm0, %v512_v45, %v513_v44  ;;  %v284_v47 = vsel %vm282_vm0, %v513_v44, %v512_v45 }
 0x105   : > { %v285_v48 = vmax.f32 %v626_v12, %v283_v46  ;;  %v286_v49 = vmax.f32 %v628_v13, %v284_v47 }
 0x107   : > { %v514_v50 = vpack.i.bf16 %v286_v49, %v285_v48 }
 0x109   : > { %515 = vrot.lane.b32.xlu1 %v514_v50, %s566_s15 }
 0x17b   : > { %v516_v57 = vpop.permute.xlu1 %515 }
 0x17c   : > { %v518_v58 = vunpack.i.h.bf16 %v516_v57  ;;  %v517_v59 = vunpack.i.l.bf16 %v516_v57 }
 0x17e   : > { %v292_v60 = vsel %vm291_vm1, %v517_v59, %v518_v58  ;;  %v293_v61 = vsel %vm291_vm1, %v518_v58, %v517_v59 }
 0x17f   : > { %v294_v62 = vmax.f32 %v285_v48, %v292_v60  ;;  %v295_v63 = vmax.f32 %v286_v49, %v293_v61 }
 0x181   : > { %344 = vmatmul.f32.vlgmr.msra.gmra.mxu0 %v294_v62  ;;  %364 = vmatmul.f32.vlgmr.msra.gmra.mxu1 %v295_v63 }
 0x1fe   : > { %v345_v0 = vpop.f32.mrf.mxu0  ;;  %v365_v1 = vpop.f32.mrf.mxu1 }
 0x1ff   : > { %v366_v2 = vadd.f32 %v365_v1, %v345_v0 }
 0x201   : > { %369 = vst.msk [vmem:[%s252_s19] sm:$0xff] %vm368_vm2, %v366_v2 }
 0x202 PF: > { %s17_s18 = sadd.s32 1, %s559_s18  }
 0x203   : > { %p14_p7 = scmp.ge.s32.totalorder %s17_s18, 4  }
 0x205   :  { %16 = sbr.rel (!%p14_p7) target bundleno = 1 (0x1), region = 83 }
 0x20a   :  { %405 = vsyncpa [#allocation3], 1 }
 0x20b   :  { %407 = vsyncpa [#allocation3 + $0x1], 1 }

// kernel: contract_block_forward.3
= control target key start
LH: loop header
LB: loop body
LE: loop exit
PB: predicated region body
PF: predicated region fallthrough
CT: control target
= control target key end

     0   :  { %s1029_s18 = smov 0   ;;  %s1163_s0 = inlined_call_operand.vmem [shape: f32[2,4,256], index: 0, kind: input, shape index: {}]   ;;  %s1164_s1 = inlined_call_operand.vmem [shape: bf16[9,8,4], index: 1, kind: input, shape index: {}]   ;;  %s1165_s2 = inlined_call_operand.vmem [shape: f32[9,1,256], index: 2, kind: input, shape index: {}]   ;;  %s1166_s3 = inlined_call_operand.vmem [shape: bf16[2,8,256], index: 3, kind: output, shape index: {0}]   ;;  %s1167_s4 = inlined_call_operand.vmem [shape: f32[2,8,1], index: 4, kind: output, shape index: {1}]   ;;  %s1168_s5 = inlined_call_operand.vmem [shape: f32[2,8,1], index: 5, kind: output, shape index: {2}]  }
   0x1 LB: > { %s919_s19 = sadd.s32 4294967295, %s989_s18   ;;  %p923_p0 = scmp.ge.s32.totalorder %s989_s18, 1  ;;  %s989_s18 = sphi %s1029_s18, %s16_s18  }
   0x2   : > { %p192_p1 = scmp.lt.s32.totalorder %s989_s18, 3 }
   0x4   : > { %p193_p2 = pnand %p923_p0, %p192_p1 }
   0x5   : > { %p228_p3 = scmp.lt.s32.totalorder (!%p193_p2), %s919_s19, 1  ;;  %s991_s24 = smov (!%p193_p2), 17  }
   0x6   : > { %196 = sbr.rel (%p193_p2) target bundleno = 476 (0x1dc), region = 32  ;;  %s992_s25 = smov (!%p193_p2), 16  }
   0x7   : > { %s993_s26 = smov (!%p193_p2), 15   ;;  %s994_s27 = smov (!%p193_p2), 1  }
   0x8   : > { %s995_s28 = smov (!%p193_p2), 127   ;;  %s996_s29 = smov (!%p193_p2), 113  }
   0x9   : > { %s997_s30 = smov (!%p193_p2), 112   ;;  %s998_s6 = smov (!%p193_p2), 111  }
   0xb   : > { %s1170_s19 = smov (!%p228_p3, %s919_s19), 1  ;;  %v258_v20 = vlaneseq  ;;  %v263_v23 = vld [vmem:[%s1165_s2] sm:$0x3]  ;;  %v936_v24 = vld [vmem:[%s1165_s2 + $0x4] sm:$0x3]  ;;  %vm303_vm2 = vcmask 1041408  }
   0xc   : > { %s1037_s20 = sshll.u32 %s1170_s19, 3  ;;  %v265_v25 = vperm.slane %v263_v23, 0  ;;  %v266_v26 = vperm.slane %v263_v23, 1  ;;  %v386_v32 = vperm.slane %v936_v24, 0  ;;  %v387_v33 = vperm.slane %v936_v24, 1 }
   0xd   : > { %s232_s23 = scalar_lea.vmem %s1163_s0, %s1037_s20  ;;  %v1047_v22 = vand.u32 127, %v258_v20  ;;  %v930_v38 = vld [vmem:[%s1165_s2 + $0x2] sm:$0x3]  ;;  %vm299_vm4 = vcmask 31744   ;;  %v940_v55 = vld [vmem:[%s1165_s2 + $0x6] sm:$0x3]  ;;  %s237_s22 = scalar_lea.vmem %s1166_s3, %s1037_s20 }
   0xe   : > { %v247_v0 = vld [vmem:[%s232_s23] sm:$0xff]  ;;  %v289_v45 = vperm.slane %v930_v38, 0  ;;  %v290_v46 = vperm.slane %v930_v38, 1  ;;  %v937_v20 = vld [vmem:[%s1164_s1 + $0x8] sm:$0xf]  ;;  %vm794_vm10 = vcmask 7168  }
   0xf   : > { %249 = vst [vmem:[#allocation1] ss:$2 sm:$0xff] %v247_v0  ;;  %vm260_vm0 = vcmp.lt.s32.totalorder %v1047_v22, 17  ;;  %vm380_vm1 = vcmp.lt.s32.totalorder %v1047_v22, 15  ;;  %vm283_vm3 = vcmp.lt.s32.totalorder %v1047_v22, 16  ;;  %vm442_vm5 = vcmp.lt.s32.totalorder %v1047_v22, 1 }
  0x10   : > { %v271_v47 = vld [vmem:[%s1164_s1] sm:$0xf]  ;;  %vm550_vm6 = vcmp.lt.s32.totalorder %v1047_v22, 127  ;;  %vm612_vm7 = vcmp.lt.s32.totalorder %v1047_v22, 113  ;;  %vm674_vm8 = vcmp.lt.s32.totalorder %v1047_v22, 112  ;;  %vm736_vm9 = vcmp.lt.s32.totalorder %v1047_v22, 111 }
  0x16   : > { %v250_v1 = vld.sshfl [vmem:[#allocation1] sm:$0xff pattern:$0x75316420]  ;;  %v251_v2 = vld.sshfl [vmem:[#allocation1 + $0x8] sm:$0xff pattern:$0x75316420] }
  0x17   : > { %254 = vrot.lane.b32.xlu1 %v250_v1, %s991_s24  ;;  %274 = vst [vmem:[#allocation1] ss:$2 sm:$0xff] %v247_v0  ;;  %v449_v1 = vperm.slane %v940_v55, 1 }
  0x1e   : > { %v275_v3 = vld.sshfl [vmem:[#allocation1] sm:$0xff pattern:$0x75316420]  ;;  %v276_v4 = vld.sshfl [vmem:[#allocation1 + $0x8] sm:$0xff pattern:$0x75316420] }
  0x1f   : > { %279 = vrot.lane.b32.xlu0 %v275_v3, %s992_s25  ;;  %256 = vrot.lane.b32.xlu1 %v251_v2, %s991_s24  ;;  %371 = vst [vmem:[#allocation1] ss:$2 sm:$0xff] %v247_v0  ;;  %v931_v2 = vld [vmem:[%s1164_s1 + $0x4] sm:$0xf] }
  0x26   : > { %v372_v5 = vld.sshfl [vmem:[#allocation1] sm:$0xff pattern:$0x75316420]  ;;  %v373_v6 = vld.sshfl [vmem:[#allocation1 + $0x8] sm:$0xff pattern:$0x75316420] }
  0x27   : > { %281 = vrot.lane.b32.xlu0 %v276_v4, %s992_s25  ;;  %376 = vrot.lane.b32.xlu2 %v372_v5, %s993_s26  ;;  %433 = vst [vmem:[#allocation1] ss:$2 sm:$0xff] %v247_v0  ;;  %s241_s25 = scalar_lea.vmem %s1167_s4, %s1037_s20 }
  0x2e   : > { %v435_v7 = vld.sshfl [vmem:[#allocation1 + $0x8] sm:$0xff pattern:$0x75316420]  ;;  %v434_v8 = vld.sshfl [vmem:[#allocation1] sm:$0xff pattern:$0x75316420] }
  0x2f   : > { %440 = vrot.lane.b32.xlu1 %v435_v7, %s994_s27  ;;  %438 = vrot.lane.b32.xlu0 %v434_v8, %s994_s27  ;;  %497 = vst [vmem:[#allocation1] ss:$2 sm:$0xff] %v247_v0 }
  0x30   : > { %378 = vrot.lane.b32.xlu2 %v373_v6, %s993_s26 }
  0x36   : > { %v1043_v9 = vld.sshfl [vmem:[#allocation1] sm:$0xff pattern:$0x75316420]  ;;  %v1045_v10 = vld.sshfl [vmem:[#allocation1 + $0x8] sm:$0xff pattern:$0x75316420] }
  0x37   : > { %541 = vst [vmem:[#allocation1] ss:$2 sm:$0xff] %v247_v0  ;;  %v502_v58 = vpack.c.bf16 %v1043_v9, %v1043_v9  ;;  %v503_v59 = vpack.c.bf16 %v1045_v10, %v1045_v10 }
  0x39   : > { %v508_v5 = vsel %vm303_vm2, %v502_v58, 0  ;;  %v511_v6 = vsel %vm303_vm2, %v503_v59, 0 }
  0x3e   : > { %v543_v11 = vld.sshfl [vmem:[#allocation1 + $0x8] sm:$0xff pattern:$0x75316420]  ;;  %v542_v12 = vld.sshfl [vmem:[#allocation1] sm:$0xff pattern:$0x75316420] }
  0x3f   : > { %548 = vrot.lane.b32.xlu0 %v543_v11, %s995_s28  ;;  %603 = vst [vmem:[#allocation1] ss:$2 sm:$0xff] %v247_v0  ;;  %546 = vrot.lane.b32.xlu2 %v542_v12, %s995_s28  ;;  %s245_s28 = scalar_lea.vmem %s1168_s5, %s1037_s20 }
  0x46   : > { %v604_v13 = vld.sshfl [vmem:[#allocation1] sm:$0xff pattern:$0x75316420]  ;;  %v605_v14 = vld.sshfl [vmem:[#allocation1 + $0x8] sm:$0xff pattern:$0x75316420] }
  0x47   : > { %608 = vrot.lane.b32.xlu1 %v604_v13, %s996_s29  ;;  %665 = vst [vmem:[#allocation1] ss:$2 sm:$0xff] %v247_v0  ;;  %610 = vrot.lane.b32.xlu2 %v605_v14, %s996_s29 }
  0x4e   : > { %v667_v15 = vld.sshfl [vmem:[#allocation1 + $0x8] sm:$0xff pattern:$0x75316420]  ;;  %v666_v16 = vld.sshfl [vmem:[#allocation1] sm:$0xff pattern:$0x75316420] }
  0x4f   : > { %672 = vrot.lane.b32.xlu1 %v667_v15, %s997_s30  ;;  %670 = vrot.lane.b32.xlu0 %v666_v16, %s997_s30  ;;  %727 = vst [vmem:[#allocation1] ss:$2 sm:$0xff] %v247_v0  ;;  %v448_v0 = vperm.slane %v940_v55, 0  ;;  %v941_v15 = vld [vmem:[%s1164_s1 + $0xc] sm:$0xf] }
  0x50   : > { %v947_v16 = vld [vmem:[%s1165_s2 + $0xa] sm:$0x3]  ;;  %v959_v55 = vld [vmem:[%s1165_s2 + $0x10] sm:$0x3] }
  0x56   : > { %v729_v17 = vld.sshfl [vmem:[#allocation1 + $0x8] sm:$0xff pattern:$0x75316420]  ;;  %v728_v18 = vld.sshfl [vmem:[#allocation1] sm:$0xff pattern:$0x75316420] }
  0x57   : > { %734 = vrot.lane.b32.xlu0 %v729_v17, %s998_s6  ;;  %732 = vrot.lane.b32.xlu2 %v728_v18, %s998_s6  ;;  %v556_v17 = vperm.slane %v947_v16, 0  ;;  %v557_v18 = vperm.slane %v947_v16, 1 }
  0x81   : > { %v377_v19 = vpop.permute.xlu2 %376 }
  0x89   : > { %v255_v21 = vpop.permute.xlu1 %254 }
  0x8a   : > { %v379_v27 = vpop.permute.xlu2 %378 }
  0x8b   : > { %v381_v34 = vsel %vm380_vm1, %v377_v19, %v379_v27  ;;  %v382_v35 = vsel %vm380_vm1, %v379_v27, %v377_v19  ;;  %v951_v27 = vld [vmem:[%s1165_s2 + $0xc] sm:$0x3] }
  0x8c   : > { %v390_v41 = vmul.f32 %v386_v32, %v382_v35  ;;  %v391_v42 = vmul.f32 %v387_v33, %v381_v34  ;;  %v618_v33 = vperm.slane %v951_v27, 0  ;;  %v619_v34 = vperm.slane %v951_v27, 1  ;;  %v948_v35 = vld [vmem:[%s1164_s1 + $0x14] sm:$0xf] }
  0x8e   : > { %v394_v51 = vpack.c.bf16 %v390_v41, %v390_v41  ;;  %v395_v52 = vpack.c.bf16 %v391_v42, %v391_v42  ;;  %v955_v41 = vld [vmem:[%s1165_s2 + $0xe] sm:$0x3] }
  0x90   : > { %v400_v60 = vsel %vm303_vm2, %v394_v51, 0  ;;  %v403_v61 = vsel %vm303_vm2, %v395_v52, 0 }
  0x91   : > { %v280_v28 = vpop.permute.xlu0 %279  ;;  %v257_v29 = vpop.permute.xlu1 %256 }
  0x92   : > { %v261_v30 = vsel %vm260_vm0, %v255_v21, %v257_v29  ;;  %v262_v31 = vsel %vm260_vm0, %v257_v29, %v255_v21 }
  0x93   : > { %v269_v36 = vmul.f32 %v265_v25, %v262_v31  ;;  %v270_v37 = vmul.f32 %v266_v26, %v261_v30 }
  0x95   : > { %v272_v39 = vpack.c.bf16 %v269_v36, %v269_v36  ;;  %v273_v40 = vpack.c.bf16 %v270_v37, %v270_v37 }
  0x97   : > { %v340_v43 = vsel %vm303_vm2, %v272_v39, 0  ;;  %v343_v44 = vsel %vm303_vm2, %v273_v40, 0 }
  0x98   : > { %352 = vmatpush.bf16.msra.mxu2 %v340_v43  ;;  %365 = vmatpush.bf16.msra.mxu3 %v343_v44 }
  0x99   : > { %v282_v48 = vpop.permute.xlu0 %281  ;;  %v547_v19 = vpop.permute.xlu2 %546 }
  0x9a   : > { %v284_v49 = vsel %vm283_vm3, %v280_v28, %v282_v48  ;;  %v285_v50 = vsel %vm283_vm3, %v282_v48, %v280_v28  ;;  %v944_v48 = vld [vmem:[%s1164_s1 + $0x10] sm:$0xf] }
  0x9b   : > { %934 = vmatmul.msk.bf16.vlgmr.msra.gmra.mxu2 %vm299_vm4, %v271_v47  ;;  %935 = vmatmul.msk.bf16.vlgmr.msra.gmra.mxu3 %vm299_vm4, %v271_v47  ;;  %v293_v53 = vmul.f32 %v289_v45, %v285_v50  ;;  %v294_v54 = vmul.f32 %v290_v46, %v284_v49  ;;  %v680_v46 = vperm.slane %v955_v41, 0  ;;  %v681_v47 = vperm.slane %v955_v41, 1 }
  0x9d   : > { %v297_v56 = vpack.c.bf16 %v293_v53, %v293_v53  ;;  %v298_v57 = vpack.c.bf16 %v294_v54, %v294_v54 }
  0x9f   : > { %v305_v62 = vsel %vm303_vm2, %v297_v56, 0  ;;  %v308_v63 = vsel %vm303_vm2, %v298_v57, 0 }
  0xa0   : > { %317 = vmatpush.bf16.msra.mxu0 %v305_v62  ;;  %330 = vmatpush.bf16.msra.mxu1 %v308_v63  ;;  %v956_v63 = vld [vmem:[%s1164_s1 + $0x1c] sm:$0xf] }
  0xa1   : > { %v441_v3 = vpop.permute.xlu1 %440  ;;  %v439_v4 = vpop.permute.xlu0 %438 }
  0xa2   : > { %v443_v7 = vsel %vm442_vm5, %v439_v4, %v441_v3  ;;  %v444_v8 = vsel %vm442_vm5, %v441_v3, %v439_v4  ;;  %v611_v32 = vpop.permute.xlu2 %610 }
  0xa3   : > { %932 = vmatmul.msk.bf16.vlgmr.msra.gmra.mxu0 %vm299_vm4, %v931_v2  ;;  %933 = vmatmul.msk.bf16.vlgmr.msra.gmra.mxu1 %vm299_vm4, %v931_v2  ;;  %v452_v9 = vmul.f32 %v448_v0, %v444_v8  ;;  %v453_v10 = vmul.f32 %v449_v1, %v443_v7  ;;  %v952_v8 = vld [vmem:[%s1164_s1 + $0x18] sm:$0xf] }
  0xa4   : > { %412 = vmatpush.bf16.msrb.mxu0 %v400_v60  ;;  %425 = vmatpush.bf16.msrb.mxu1 %v403_v61  ;;  %v742_v60 = vperm.slane %v959_v55, 0  ;;  %v743_v61 = vperm.slane %v959_v55, 1 }
  0xa5   : > { %v456_v11 = vpack.c.bf16 %v452_v9, %v452_v9  ;;  %v457_v12 = vpack.c.bf16 %v453_v10, %v453_v10  ;;  %v960_v9 = vld [vmem:[%s1164_s1 + $0x20] sm:$0xf] }
  0xa7   : > { %v462_v13 = vsel %vm303_vm2, %v456_v11, 0  ;;  %v465_v14 = vsel %vm303_vm2, %v457_v12, 0 }
  0xa8   : > { %520 = vmatpush.bf16.msra.mxu0 %v508_v5  ;;  %533 = vmatpush.bf16.msra.mxu1 %v511_v6 }
  0xa9   : > { %474 = vmatpush.bf16.msrb.mxu2 %v462_v13  ;;  %487 = vmatpush.bf16.msrb.mxu3 %v465_v14 }
  0xac   : > { %942 = vmatmul.msk.bf16.vlgmr.msrb.gmra.mxu2 %vm299_vm4, %v941_v15  ;;  %943 = vmatmul.msk.bf16.vlgmr.msrb.gmra.mxu3 %vm299_vm4, %v941_v15 }
  0xb1   : > { %v549_v21 = vpop.permute.xlu0 %548  ;;  %v733_v62 = vpop.permute.xlu2 %732 }
  0xb2   : > { %v551_v23 = vsel %vm550_vm6, %v547_v19, %v549_v21  ;;  %v552_v24 = vsel %vm550_vm6, %v549_v21, %v547_v19 }
  0xb3   : > { %938 = vmatmul.msk.bf16.vlgmr.msrb.gmra.mxu0 %vm299_vm4, %v937_v20  ;;  %939 = vmatmul.msk.bf16.vlgmr.msrb.gmra.mxu1 %vm299_vm4, %v937_v20  ;;  %v560_v25 = vmul.f32 %v556_v17, %v551_v23  ;;  %v561_v26 = vmul.f32 %v557_v18, %v552_v24 }
  0xb5   : > { %v564_v28 = vpack.c.bf16 %v560_v25, %v560_v25  ;;  %v565_v29 = vpack.c.bf16 %v561_v26, %v561_v26 }
  0xb7   : > { %v570_v30 = vsel %vm303_vm2, %v564_v28, 0  ;;  %v573_v31 = vsel %vm303_vm2, %v565_v29, 0 }
  0xb8   : > { %582 = vmatpush.bf16.msra.mxu2 %v570_v30  ;;  %595 = vmatpush.bf16.msra.mxu3 %v573_v31 }
  0xb9   : > { %v609_v36 = vpop.permute.xlu1 %608 }
  0xba   : > { %v613_v37 = vsel %vm612_vm7, %v609_v36, %v611_v32  ;;  %v614_v38 = vsel %vm612_vm7, %v611_v32, %v609_v36 }
  0xbb   : > { %v622_v39 = vmul.f32 %v618_v33, %v613_v37  ;;  %v623_v40 = vmul.f32 %v619_v34, %v614_v38 }
  0xbc   : > { %949 = vmatmul.msk.bf16.vlgmr.msra.gmra.mxu2 %vm299_vm4, %v948_v35  ;;  %950 = vmatmul.msk.bf16.vlgmr.msra.gmra.mxu3 %vm299_vm4, %v948_v35 }
  0xbd   : > { %v626_v42 = vpack.c.bf16 %v622_v39, %v622_v39  ;;  %v627_v43 = vpack.c.bf16 %v623_v40, %v623_v40 }
  0xbf   : > { %v632_v44 = vsel %vm303_vm2, %v626_v42, 0  ;;  %v635_v45 = vsel %vm303_vm2, %v627_v43, 0 }
  0xc0   : > { %644 = vmatpush.bf16.msrb.mxu0 %v632_v44  ;;  %657 = vmatpush.bf16.msrb.mxu1 %v635_v45 }
  0xc1   : > { %v673_v49 = vpop.permute.xlu1 %672  ;;  %v671_v50 = vpop.permute.xlu0 %670 }
  0xc2   : > { %v675_v51 = vsel %vm674_vm8, %v671_v50, %v673_v49  ;;  %v676_v52 = vsel %vm674_vm8, %v673_v49, %v671_v50 }
  0xc3   : > { %945 = vmatmul.msk.bf16.vlgmr.msra.gmra.mxu0 %vm299_vm4, %v944_v48  ;;  %946 = vmatmul.msk.bf16.vlgmr.msra.gmra.mxu1 %vm299_vm4, %v944_v48  ;;  %v684_v53 = vmul.f32 %v680_v46, %v675_v51  ;;  %v685_v54 = vmul.f32 %v681_v47, %v676_v52 }
  0xc5   : > { %v688_v56 = vpack.c.bf16 %v684_v53, %v684_v53  ;;  %v689_v57 = vpack.c.bf16 %v685_v54, %v685_v54 }
  0xc7   : > { %v694_v58 = vsel %vm303_vm2, %v688_v56, 0  ;;  %v697_v59 = vsel %vm303_vm2, %v689_v57, 0 }
  0xc8   : > { %706 = vmatpush.bf16.msrb.mxu2 %v694_v58  ;;  %719 = vmatpush.bf16.msrb.mxu3 %v697_v59 }
  0xc9   : > { %v735_v0 = vpop.permute.xlu0 %734 }
  0xca   : > { %v737_v1 = vsel %vm736_vm9, %v733_v62, %v735_v0  ;;  %v738_v2 = vsel %vm736_vm9, %v735_v0, %v733_v62 }
  0xcb   : > { %v746_v3 = vmul.f32 %v742_v60, %v737_v1  ;;  %v747_v4 = vmul.f32 %v743_v61, %v738_v2 }
  0xcc   : > { %957 = vmatmul.msk.bf16.vlgmr.msrb.gmra.mxu2 %vm299_vm4, %v956_v63  ;;  %958 = vmatmul.msk.bf16.vlgmr.msrb.gmra.mxu3 %vm299_vm4, %v956_v63 }
  0xcd   : > { %v750_v22 = vpack.c.bf16 %v746_v3, %v746_v3  ;;  %v751_v5 = vpack.c.bf16 %v747_v4, %v747_v4 }
  0xcf   : > { %v756_v6 = vsel %vm303_vm2, %v750_v22, 0  ;;  %v759_v7 = vsel %vm303_vm2, %v751_v5, 0 }
  0xd0   : > { %768 = vmatpush.bf16.msra.mxu0 %v756_v6  ;;  %781 = vmatpush.bf16.msra.mxu1 %v759_v7 }
  0xd3   : > { %953 = vmatmul.msk.bf16.vlgmr.msrb.gmra.mxu0 %vm299_vm4, %v952_v8  ;;  %954 = vmatmul.msk.bf16.vlgmr.msrb.gmra.mxu1 %vm299_vm4, %v952_v8 }
  0xe3   : > { %961 = vmatmul.msk.bf16.vlgmr.msra.gmra.mxu0 %vm299_vm4, %v960_v9  ;;  %962 = vmatmul.msk.bf16.vlgmr.msra.gmra.mxu1 %vm299_vm4, %v960_v9 }
 0x11e   : > { %v354_v10 = vpop.f32.mrf.mxu2  ;;  %v367_v11 = vpop.f32.mrf.mxu3 }
 0x120   : > { %v319_v12 = vpop.f32.mrf.mxu0  ;;  %v332_v13 = vpop.f32.mrf.mxu1 }
 0x121   : > { %v355_v35 = vadd.f32 %v354_v10, %v319_v12  ;;  %v368_v36 = vadd.f32 %v367_v11, %v332_v13 }
 0x126   : > { %v356_v14 = vpop.f32.mrf.mxu2  ;;  %v369_v15 = vpop.f32.mrf.mxu3 }
 0x128   : > { %v321_v16 = vpop.f32.mrf.mxu0  ;;  %v334_v17 = vpop.f32.mrf.mxu1 }
 0x12f   : > { %v476_v18 = vpop.f32.mrf.mxu2  ;;  %v489_v19 = vpop.f32.mrf.mxu3 }
 0x130   : > { %v414_v20 = vpop.f32.mrf.mxu0  ;;  %v427_v21 = vpop.f32.mrf.mxu1 }
 0x131   : > { %v431_v39 = vadd.f32 %v414_v20, %v355_v35  ;;  %v432_v40 = vadd.f32 %v427_v21, %v368_v36 }
 0x133   : > { %v493_v43 = vadd.f32 %v476_v18, %v431_v39  ;;  %v494_v44 = vadd.f32 %v489_v19, %v432_v40 }
 0x137   : > { %v478_v23 = vpop.f32.mrf.mxu2  ;;  %v491_v24 = vpop.f32.mrf.mxu3 }
 0x138   : > { %v416_v25 = vpop.f32.mrf.mxu0  ;;  %v429_v26 = vpop.f32.mrf.mxu1 }
 0x13f   : > { %v584_v27 = vpop.f32.mrf.mxu2  ;;  %v597_v28 = vpop.f32.mrf.mxu3 }
 0x140   : > { %v522_v29 = vpop.f32.mrf.mxu0  ;;  %v535_v30 = vpop.f32.mrf.mxu1 }
 0x141   : > { %v539_v45 = vadd.f32 %v522_v29, %v493_v43  ;;  %v540_v46 = vadd.f32 %v535_v30, %v494_v44 }
 0x143   : > { %v601_v51 = vadd.f32 %v584_v27, %v539_v45  ;;  %v602_v52 = vadd.f32 %v597_v28, %v540_v46 }
 0x147   : > { %v586_v31 = vpop.f32.mrf.mxu2  ;;  %v599_v32 = vpop.f32.mrf.mxu3 }
 0x148   : > { %v524_v33 = vpop.f32.mrf.mxu0  ;;  %v537_v34 = vpop.f32.mrf.mxu1 }
 0x14f   : > { %v708_v37 = vpop.f32.mrf.mxu2  ;;  %v721_v38 = vpop.f32.mrf.mxu3 }
 0x150   : > { %v646_v41 = vpop.f32.mrf.mxu0  ;;  %v659_v42 = vpop.f32.mrf.mxu1 }
 0x151   : > { %v663_v53 = vadd.f32 %v646_v41, %v601_v51  ;;  %v664_v54 = vadd.f32 %v659_v42, %v602_v52 }
 0x153   : > { %v725_v55 = vadd.f32 %v708_v37, %v663_v53  ;;  %v726_v56 = vadd.f32 %v721_v38, %v664_v54 }
 0x157   : > { %v710_v47 = vpop.f32.mrf.mxu2  ;;  %v723_v48 = vpop.f32.mrf.mxu3 }
 0x158   : > { %v648_v49 = vpop.f32.mrf.mxu0  ;;  %v661_v50 = vpop.f32.mrf.mxu1 }
 0x160   : > { %v770_v57 = vpop.f32.mrf.mxu0  ;;  %v783_v58 = vpop.f32.mrf.mxu1 }
 0x161   : > { %v787_v59 = vadd.f32 %v770_v57, %v725_v55  ;;  %v788_v60 = vadd.f32 %v783_v58, %v726_v56 }
 0x163   : > { %v789_v61 = vpack.c.bf16 %v788_v60, %v787_v59  ;;  %v791_v62 = vadd.f32 %v788_v60, %v787_v59  ;;  %v796_v63 = vmul.f32 %v787_v59, %v787_v59  ;;  %v797_v0 = vmul.f32 %v788_v60, %v788_v60 }
 0x165   : > { %790 = vst [vmem:[%s237_s22] sm:$0xff] %v789_v61  ;;  %792 = vadd.xlane.f32.xlu1 %v791_v62  ;;  %v798_v1 = vadd.f32 %v797_v0, %v796_v63 }
 0x167   : > { %799 = vadd.xlane.f32.xlu2 %v798_v1 }
 0x168   : > { %v772_v2 = vpop.f32.mrf.mxu0  ;;  %v785_v3 = vpop.f32.mrf.mxu1 }
 0x1d8   : > { %v793_v4 = vpop.xlane.xlu1 %792 }
 0x1d9   : > { %795 = vst.msk [vmem:[%s241_s25] sm:$0xff] %vm794_vm10, %v793_v4 }
 0x1da   : > { %v800_v22 = vpop.xlane.xlu2 %799 }
 0x1db   : > { %801 = vst.msk [vmem:[%s245_s28] sm:$0xff] %vm794_vm10, %v800_v22 }
 0x1dc PF: > { %s16_s18 = sadd.s32 1, %s989_s18  }
 0x1dd   : > { %p13_p4 = scmp.ge.s32.totalorder %s16_s18, 4  }
 0x1df   :  { %15 = sbr.rel (!%p13_p4) target bundleno = 1 (0x1), region = 101 }

// kernel: contract_block_forward.4
= control target key start
LH: loop header
LB: loop body
LE: loop exit
PB: predicated region body
PF: predicated region fallthrough
CT: control target
= control target key end

     0   :  { %s1070_s24 = smov 0   ;;  %s1234_s0 = inlined_call_operand.vmem [shape: bf16[2,8,256], index: 0, kind: input, shape index: {}]   ;;  %s1235_s1 = inlined_call_operand.vmem [shape: f32[8,1], index: 1, kind: input, shape index: {}]   ;;  %s1236_s2 = inlined_call_operand.vmem [shape: f32[8,1], index: 2, kind: input, shape index: {}]   ;;  %s1237_s3 = inlined_call_operand.vmem [shape: bf16[9,8,8], index: 3, kind: input, shape index: {}]   ;;  %s1238_s4 = inlined_call_operand.vmem [shape: f32[9,1,256], index: 4, kind: input, shape index: {}]   ;;  %s1239_s5 = inlined_call_operand.vmem [shape: bf16[2,8,256], index: 5, kind: output, shape index: {0}]   ;;  %s1240_s6 = inlined_call_operand.vmem [shape: f32[2,8,1], index: 6, kind: output, shape index: {1}]   ;;  %s1241_s7 = inlined_call_operand.vmem [shape: f32[2,8,1], index: 7, kind: output, shape index: {2}]  }
   0x1 LB: > { %s947_s25 = sadd.s32 4294967295, %s1019_s24   ;;  %p951_p0 = scmp.ge.s32.totalorder %s1019_s24, 1  ;;  %s1019_s24 = sphi %s1070_s24, %s18_s24  }
   0x2   : > { %p242_p1 = scmp.lt.s32.totalorder %s1019_s24, 3 }
   0x4   : > { %p243_p2 = pnand %p951_p0, %p242_p1 }
   0x5   : > { %p282_p3 = scmp.lt.s32.totalorder (!%p243_p2), %s947_s25, 1  ;;  %s1022_s11 = smov (!%p243_p2), 15  }
   0x6   : > { %246 = sbr.rel (%p243_p2) target bundleno = 587 (0x24b), region = 40  ;;  %s1023_s12 = smov (!%p243_p2), 17  }
   0x7   : > { %s1024_s13 = smov (!%p243_p2), 16   ;;  %s1025_s14 = smov (!%p243_p2), 1  }
   0x8   : > { %s1026_s15 = smov (!%p243_p2), 113   ;;  %s1027_s16 = smov (!%p243_p2), 112  }
   0x9   : > { %s1028_s17 = smov (!%p243_p2), 127   ;;  %s1029_s18 = smov (!%p243_p2), 111  }
   0xb   : > { %v304_v0 = vld [vmem:[%s1235_s1] sm:$0xff]  ;;  %v1021_v1 = vmov 0   ;;  %s1243_s25 = smov (!%p282_p3, %s947_s25), 1  ;;  %v326_v14 = vlaneseq  ;;  %vm366_vm1 = vcmask 1043456   ;;  %vm362_vm2 = vcmask 64512  }
   0xc   : > { %1012 = vset.pattern.permute.xlu0 %v1021_v1  ;;  %v312_v2 = vld [vmem:[%s1236_s2] sm:$0xff]  ;;  %s1084_s30 = sshll.u32 %s1243_s25, 3  ;;  %v969_v61 = vld [vmem:[%s1237_s3 + $0xc] sm:$0xf]  ;;  %vm822_vm10 = vcmask 7168  }
   0xd   : > { %307 = vperm.xlu0 %1012, %v304_v0   ;;  %s286_s10 = scalar_lea.vmem %s1234_s0, %s1084_s30  ;;  %v1110_v16 = vand.u32 127, %v326_v14  ;;  %v331_v17 = vld [vmem:[%s1238_s4] sm:$0x3]  ;;  %v968_v32 = vld [vmem:[%s1238_s4 + $0x6] sm:$0x3]  ;;  %s299_s19 = scalar_lea.vmem %s1241_s7, %s1084_s30 }
   0xe   : > { %v301_v4 = vld [vmem:[%s286_s10] sm:$0xff]  ;;  %v333_v18 = vperm.slane %v331_v17, 0  ;;  %v334_v19 = vperm.slane %v331_v17, 1  ;;  %v501_v35 = vperm.slane %v968_v32, 0  ;;  %v502_v36 = vperm.slane %v968_v32, 1 }
   0xf   : > { %v302_v5 = vunpack.c.l.bf16 %v301_v4  ;;  %v303_v8 = vunpack.c.h.bf16 %v301_v4  ;;  %vm328_vm0 = vcmp.lt.s32.totalorder %v1110_v16, 17  ;;  %v339_v29 = vld [vmem:[%s1237_s3] sm:$0xf]  ;;  %vm495_vm3 = vcmp.lt.s32.totalorder %v1110_v16, 1  ;;  %v964_v51 = vld [vmem:[%s1238_s4 + $0x4] sm:$0x3] }
  0x10   : > { %v958_v34 = vld [vmem:[%s1238_s4 + $0x2] sm:$0x3]  ;;  %vm346_vm4 = vcmp.lt.s32.totalorder %v1110_v16, 16  ;;  %vm438_vm5 = vcmp.lt.s32.totalorder %v1110_v16, 15  ;;  %v444_v59 = vperm.slane %v964_v51, 0  ;;  %v445_v60 = vperm.slane %v964_v51, 1 }
  0x11   : > { %v352_v37 = vperm.slane %v958_v34, 0  ;;  %v353_v38 = vperm.slane %v958_v34, 1  ;;  %v959_v63 = vld [vmem:[%s1237_s3 + $0x4] sm:$0xf]  ;;  %vm707_vm6 = vcmp.lt.s32.totalorder %v1110_v16, 112  ;;  %vm593_vm7 = vcmp.lt.s32.totalorder %v1110_v16, 127 }
  0x12   : > { %vm650_vm8 = vcmp.lt.s32.totalorder %v1110_v16, 113  ;;  %vm764_vm9 = vcmp.lt.s32.totalorder %v1110_v16, 111  ;;  %v972_v16 = vld [vmem:[%s1237_s3 + $0x10] sm:$0xf] }
  0x15   : > { %315 = vperm.xlu0 %1012, %v312_v2  }
  0x7f   : > { %v308_v3 = vpop.permute.xlu0 %307 }
  0x80   : > { %v310_v6 = vmul.f32 %v308_v3, %v302_v5  ;;  %v311_v11 = vmul.f32 %v308_v3, %v303_v8  ;;  %v983_v5 = vld [vmem:[%s1238_s4 + $0xe] sm:$0x3] }
  0x81   : > { %v714_v14 = vperm.slane %v983_v5, 1 }
  0x87   : > { %v316_v7 = vpop.permute.xlu0 %315 }
  0x88   : > { %v318_v9 = vadd.f32 %v316_v7, %v310_v6  ;;  %v319_v12 = vadd.f32 %v316_v7, %v311_v11  ;;  %v975_v7 = vld [vmem:[%s1238_s4 + $0xa] sm:$0x3] }
  0x8a   : > { %v1090_v10 = vmax.f32 %v318_v9, 0.0  ;;  %v1095_v13 = vmax.f32 %v319_v12, 0.0  ;;  %v713_v12 = vperm.slane %v983_v5, 0 }
  0x8c   : > { %434 = vrot.lane.b32.xlu0 %v1090_v10, %s1022_s11  ;;  %322 = vrot.lane.b32.xlu2 %v1090_v10, %s1023_s12  ;;  %v551_v6 = vpack.c.bf16 %v1095_v13, %v1095_v13  ;;  %v550_v8 = vpack.c.bf16 %v1090_v10, %v1090_v10 }
  0x8d   : > { %342 = vrot.lane.b32.xlu1 %v1090_v10, %s1024_s13 }
  0x94   : > { %493 = vrot.lane.b32.xlu0 %v1095_v13, %s1025_s14  ;;  %324 = vrot.lane.b32.xlu2 %v1095_v13, %s1023_s12 }
  0x95   : > { %344 = vrot.lane.b32.xlu1 %v1095_v13, %s1024_s13  ;;  %s291_s13 = scalar_lea.vmem %s1239_s5, %s1084_s30 }
  0x9c   : > { %646 = vrot.lane.b32.xlu0 %v1090_v10, %s1026_s15  ;;  %491 = vrot.lane.b32.xlu2 %v1090_v10, %s1025_s14 }
  0x9d   : > { %436 = vrot.lane.b32.xlu1 %v1095_v13, %s1022_s11 }
  0xa4   : > { %705 = vrot.lane.b32.xlu0 %v1095_v13, %s1027_s16  ;;  %591 = vrot.lane.b32.xlu2 %v1095_v13, %s1028_s17 }
  0xa5   : > { %589 = vrot.lane.b32.xlu1 %v1090_v10, %s1028_s17 }
  0xac   : > { %703 = vrot.lane.b32.xlu2 %v1090_v10, %s1027_s16  ;;  %s295_s16 = scalar_lea.vmem %s1240_s6, %s1084_s30 }
  0xad   : > { %648 = vrot.lane.b32.xlu1 %v1095_v13, %s1026_s15 }
  0xb4   : > { %762 = vrot.lane.b32.xlu2 %v1095_v13, %s1029_s18  ;;  %v599_v13 = vperm.slane %v975_v7, 0 }
  0xb5   : > { %760 = vrot.lane.b32.xlu1 %v1090_v10, %s1029_s18  ;;  %v559_v10 = vsel %vm366_vm1, %v551_v6, 0 }
  0xe6   : > { %v323_v15 = vpop.permute.xlu2 %322 }
  0xee   : > { %v325_v20 = vpop.permute.xlu2 %324 }
  0xef   : > { %v329_v21 = vsel %vm328_vm0, %v323_v15, %v325_v20  ;;  %v330_v22 = vsel %vm328_vm0, %v325_v20, %v323_v15 }
  0xf0   : > { %v337_v23 = vmul.f32 %v333_v18, %v330_v22  ;;  %v338_v24 = vmul.f32 %v334_v19, %v329_v21  ;;  %v600_v18 = vperm.slane %v975_v7, 1  ;;  %v556_v21 = vsel %vm366_vm1, %v550_v8, 0 }
  0xf2   : > { %v340_v25 = vpack.c.bf16 %v337_v23, %v337_v23  ;;  %v341_v26 = vpack.c.bf16 %v338_v24, %v338_v24 }
  0xf4   : > { %v403_v27 = vsel %vm366_vm1, %v340_v25, 0  ;;  %v406_v28 = vsel %vm366_vm1, %v341_v26, 0 }
  0xf5   : > { %415 = vmatpush.bf16.msra.mxu2 %v403_v27  ;;  %428 = vmatpush.bf16.msra.mxu3 %v406_v28 }
  0xf6   : > { %v492_v33 = vpop.permute.xlu2 %491 }
  0xf8   : > { %962 = vmatmul.msk.bf16.vlgmr.msra.gmra.mxu2 %vm362_vm2, %v339_v29  ;;  %963 = vmatmul.msk.bf16.vlgmr.msra.gmra.mxu3 %vm362_vm2, %v339_v29 }
  0xfe   : > { %v435_v30 = vpop.permute.xlu0 %434  ;;  %v592_v54 = vpop.permute.xlu2 %591 }
  0xff   : > { %v343_v31 = vpop.permute.xlu1 %342 }
 0x106   : > { %v494_v39 = vpop.permute.xlu0 %493  ;;  %v704_v19 = vpop.permute.xlu2 %703 }
 0x107   : > { %v496_v40 = vsel %vm495_vm3, %v492_v33, %v494_v39  ;;  %v497_v41 = vsel %vm495_vm3, %v494_v39, %v492_v33  ;;  %v345_v42 = vpop.permute.xlu1 %344  ;;  %v979_v33 = vld [vmem:[%s1238_s4 + $0xc] sm:$0x3] }
 0x108   : > { %v505_v43 = vmul.f32 %v501_v35, %v497_v41  ;;  %v506_v44 = vmul.f32 %v502_v36, %v496_v40  ;;  %v347_v45 = vsel %vm346_vm4, %v343_v31, %v345_v42  ;;  %v348_v46 = vsel %vm346_vm4, %v345_v42, %v343_v31  ;;  %v965_v42 = vld [vmem:[%s1237_s3 + $0x8] sm:$0xf] }
 0x109   : > { %v356_v47 = vmul.f32 %v352_v37, %v348_v46  ;;  %v357_v48 = vmul.f32 %v353_v38, %v347_v45  ;;  %v656_v40 = vperm.slane %v979_v33, 0  ;;  %v657_v41 = vperm.slane %v979_v33, 1 }
 0x10a   : > { %v509_v49 = vpack.c.bf16 %v505_v43, %v505_v43  ;;  %v510_v50 = vpack.c.bf16 %v506_v44, %v506_v44  ;;  %v976_v44 = vld [vmem:[%s1237_s3 + $0x14] sm:$0xf] }
 0x10b   : > { %v360_v52 = vpack.c.bf16 %v356_v47, %v356_v47  ;;  %v361_v53 = vpack.c.bf16 %v357_v48, %v357_v48 }
 0x10c   : > { %v515_v55 = vsel %vm366_vm1, %v509_v49, 0  ;;  %v518_v56 = vsel %vm366_vm1, %v510_v50, 0  ;;  %v987_v49 = vld [vmem:[%s1238_s4 + $0x10] sm:$0x3] }
 0x10d   : > { %v368_v57 = vsel %vm366_vm1, %v360_v52, 0  ;;  %v371_v58 = vsel %vm366_vm1, %v361_v53, 0  ;;  %527 = vmatpush.bf16.msrb.mxu2 %v515_v55  ;;  %540 = vmatpush.bf16.msrb.mxu3 %v518_v56  ;;  %v771_v55 = vperm.slane %v987_v49, 1 }
 0x10e   : > { %380 = vmatpush.bf16.msra.mxu0 %v368_v57  ;;  %393 = vmatpush.bf16.msra.mxu1 %v371_v58  ;;  %v1142_v62 = vpop.permute.xlu0 %646  ;;  %v763_v56 = vpop.permute.xlu2 %762 }
 0x10f   : > { %v437_v0 = vpop.permute.xlu1 %436 }
 0x110   : > { %v439_v1 = vsel %vm438_vm5, %v435_v30, %v437_v0  ;;  %v440_v2 = vsel %vm438_vm5, %v437_v0, %v435_v30  ;;  %970 = vmatmul.msk.bf16.vlgmr.msrb.gmra.mxu2 %vm362_vm2, %v969_v61  ;;  %971 = vmatmul.msk.bf16.vlgmr.msrb.gmra.mxu3 %vm362_vm2, %v969_v61  ;;  %v984_v0 = vld [vmem:[%s1237_s3 + $0x1c] sm:$0xf] }
 0x111   : > { %v448_v3 = vmul.f32 %v444_v59, %v440_v2  ;;  %v449_v4 = vmul.f32 %v445_v60, %v439_v1  ;;  %960 = vmatmul.msk.bf16.vlgmr.msra.gmra.mxu0 %vm362_vm2, %v959_v63  ;;  %961 = vmatmul.msk.bf16.vlgmr.msra.gmra.mxu1 %vm362_vm2, %v959_v63 }
 0x113   : > { %v452_v9 = vpack.c.bf16 %v448_v3, %v448_v3  ;;  %v453_v11 = vpack.c.bf16 %v449_v4, %v449_v4  ;;  %v980_v3 = vld [vmem:[%s1237_s3 + $0x18] sm:$0xf]  ;;  %v988_v4 = vld [vmem:[%s1237_s3 + $0x20] sm:$0xf] }
 0x115   : > { %v458_v15 = vsel %vm366_vm1, %v452_v9, 0  ;;  %v461_v17 = vsel %vm366_vm1, %v453_v11, 0 }
 0x116   : > { %470 = vmatpush.bf16.msrb.mxu0 %v458_v15  ;;  %483 = vmatpush.bf16.msrb.mxu1 %v461_v17  ;;  %v706_v20 = vpop.permute.xlu0 %705 }
 0x117   : > { %v708_v22 = vsel %vm707_vm6, %v704_v19, %v706_v20  ;;  %v709_v23 = vsel %vm707_vm6, %v706_v20, %v704_v19  ;;  %v590_v24 = vpop.permute.xlu1 %589 }
 0x118   : > { %v717_v25 = vmul.f32 %v713_v12, %v708_v22  ;;  %v718_v26 = vmul.f32 %v714_v14, %v709_v23  ;;  %v594_v27 = vsel %vm593_vm7, %v590_v24, %v592_v54  ;;  %v595_v28 = vsel %vm593_vm7, %v592_v54, %v590_v24 }
 0x119   : > { %v603_v29 = vmul.f32 %v599_v13, %v594_v27  ;;  %v604_v30 = vmul.f32 %v600_v18, %v595_v28  ;;  %v770_v54 = vperm.slane %v987_v49, 0 }
 0x11a   : > { %581 = vmatpush.bf16.msra.mxu1 %v559_v10  ;;  %568 = vmatpush.bf16.msra.mxu0 %v556_v21  ;;  %v721_v31 = vpack.c.bf16 %v717_v25, %v717_v25  ;;  %v722_v32 = vpack.c.bf16 %v718_v26, %v718_v26 }
 0x11b   : > { %v607_v34 = vpack.c.bf16 %v603_v29, %v603_v29  ;;  %v608_v35 = vpack.c.bf16 %v604_v30, %v604_v30 }
 0x11c   : > { %v727_v36 = vsel %vm366_vm1, %v721_v31, 0  ;;  %v730_v37 = vsel %vm366_vm1, %v722_v32, 0 }
 0x11d   : > { %v613_v38 = vsel %vm366_vm1, %v607_v34, 0  ;;  %v616_v39 = vsel %vm366_vm1, %v608_v35, 0 }
 0x11e   : > { %625 = vmatpush.bf16.msra.mxu2 %v613_v38  ;;  %638 = vmatpush.bf16.msra.mxu3 %v616_v39 }
 0x11f   : > { %v649_v43 = vpop.permute.xlu1 %648 }
 0x120   : > { %v651_v45 = vsel %vm650_vm8, %v1142_v62, %v649_v43  ;;  %v652_v46 = vsel %vm650_vm8, %v649_v43, %v1142_v62 }
 0x121   : > { %v660_v47 = vmul.f32 %v656_v40, %v651_v45  ;;  %v661_v48 = vmul.f32 %v657_v41, %v652_v46  ;;  %966 = vmatmul.msk.bf16.vlgmr.msrb.gmra.mxu0 %vm362_vm2, %v965_v42  ;;  %967 = vmatmul.msk.bf16.vlgmr.msrb.gmra.mxu1 %vm362_vm2, %v965_v42 }
 0x122   : > { %739 = vmatpush.bf16.msrb.mxu2 %v727_v36  ;;  %752 = vmatpush.bf16.msrb.mxu3 %v730_v37 }
 0x123   : > { %977 = vmatmul.msk.bf16.vlgmr.msra.gmra.mxu2 %vm362_vm2, %v976_v44  ;;  %978 = vmatmul.msk.bf16.vlgmr.msra.gmra.mxu3 %vm362_vm2, %v976_v44  ;;  %v664_v50 = vpack.c.bf16 %v660_v47, %v660_v47  ;;  %v665_v51 = vpack.c.bf16 %v661_v48, %v661_v48 }
 0x125   : > { %v670_v52 = vsel %vm366_vm1, %v664_v50, 0  ;;  %v673_v53 = vsel %vm366_vm1, %v665_v51, 0 }
 0x126   : > { %682 = vmatpush.bf16.msrb.mxu0 %v670_v52  ;;  %695 = vmatpush.bf16.msrb.mxu1 %v673_v53 }
 0x127   : > { %v761_v57 = vpop.permute.xlu1 %760 }
 0x128   : > { %v765_v58 = vsel %vm764_vm9, %v761_v57, %v763_v56  ;;  %v766_v59 = vsel %vm764_vm9, %v763_v56, %v761_v57 }
 0x129   : > { %v774_v60 = vmul.f32 %v770_v54, %v765_v58  ;;  %v775_v61 = vmul.f32 %v771_v55, %v766_v59 }
 0x12b   : > { %v778_v62 = vpack.c.bf16 %v774_v60, %v774_v60  ;;  %v779_v63 = vpack.c.bf16 %v775_v61, %v775_v61 }
 0x12d   : > { %v784_v1 = vsel %vm366_vm1, %v778_v62, 0  ;;  %v787_v2 = vsel %vm366_vm1, %v779_v63, 0 }
 0x131   : > { %973 = vmatmul.msk.bf16.vlgmr.msra.gmra.mxu0 %vm362_vm2, %v972_v16  ;;  %974 = vmatmul.msk.bf16.vlgmr.msra.gmra.mxu1 %vm362_vm2, %v972_v16 }
 0x132   : > { %796 = vmatpush.bf16.msra.mxu0 %v784_v1  ;;  %809 = vmatpush.bf16.msra.mxu1 %v787_v2 }
 0x133   : > { %985 = vmatmul.msk.bf16.vlgmr.msrb.gmra.mxu2 %vm362_vm2, %v984_v0  ;;  %986 = vmatmul.msk.bf16.vlgmr.msrb.gmra.mxu3 %vm362_vm2, %v984_v0 }
 0x141   : > { %981 = vmatmul.msk.bf16.vlgmr.msrb.gmra.mxu0 %vm362_vm2, %v980_v3  ;;  %982 = vmatmul.msk.bf16.vlgmr.msrb.gmra.mxu1 %vm362_vm2, %v980_v3 }
 0x151   : > { %989 = vmatmul.msk.bf16.vlgmr.msra.gmra.mxu0 %vm362_vm2, %v988_v4  ;;  %990 = vmatmul.msk.bf16.vlgmr.msra.gmra.mxu1 %vm362_vm2, %v988_v4 }
 0x17b   : > { %v417_v5 = vpop.f32.mrf.mxu2  ;;  %v430_v6 = vpop.f32.mrf.mxu3 }
 0x183   : > { %v419_v7 = vpop.f32.mrf.mxu2  ;;  %v432_v8 = vpop.f32.mrf.mxu3 }
 0x18e   : > { %v382_v9 = vpop.f32.mrf.mxu0  ;;  %v395_v11 = vpop.f32.mrf.mxu1 }
 0x18f   : > { %v418_v32 = vadd.f32 %v417_v5, %v382_v9  ;;  %v431_v33 = vadd.f32 %v430_v6, %v395_v11 }
 0x193   : > { %v529_v12 = vpop.f32.mrf.mxu2  ;;  %v542_v14 = vpop.f32.mrf.mxu3 }
 0x196   : > { %v384_v15 = vpop.f32.mrf.mxu0  ;;  %v397_v17 = vpop.f32.mrf.mxu1 }
 0x19b   : > { %v531_v13 = vpop.f32.mrf.mxu2  ;;  %v544_v18 = vpop.f32.mrf.mxu3 }
 0x19e   : > { %v472_v19 = vpop.f32.mrf.mxu0  ;;  %v485_v20 = vpop.f32.mrf.mxu1 }
 0x19f   : > { %v489_v34 = vadd.f32 %v472_v19, %v418_v32  ;;  %v490_v35 = vadd.f32 %v485_v20, %v431_v33 }
 0x1a1   : > { %v546_v40 = vadd.f32 %v529_v12, %v489_v34  ;;  %v547_v41 = vadd.f32 %v542_v14, %v490_v35 }
 0x1a6   : > { %v627_v10 = vpop.f32.mrf.mxu2  ;;  %v640_v21 = vpop.f32.mrf.mxu3 }
 0x1a7   : > { %v474_v22 = vpop.f32.mrf.mxu0  ;;  %v487_v23 = vpop.f32.mrf.mxu1 }
 0x1ae   : > { %v629_v24 = vpop.f32.mrf.mxu2  ;;  %v642_v25 = vpop.f32.mrf.mxu3 }
 0x1af   : > { %v570_v26 = vpop.f32.mrf.mxu0  ;;  %v583_v27 = vpop.f32.mrf.mxu1 }
 0x1b0   : > { %v587_v42 = vadd.f32 %v570_v26, %v546_v40  ;;  %v588_v43 = vadd.f32 %v583_v27, %v547_v41 }
 0x1b2   : > { %v644_v46 = vadd.f32 %v627_v10, %v587_v42  ;;  %v645_v47 = vadd.f32 %v640_v21, %v588_v43 }
 0x1b6   : > { %v741_v30 = vpop.f32.mrf.mxu2  ;;  %v754_v31 = vpop.f32.mrf.mxu3 }
 0x1b7   : > { %v572_v28 = vpop.f32.mrf.mxu0  ;;  %v585_v29 = vpop.f32.mrf.mxu1 }
 0x1be   : > { %v743_v38 = vpop.f32.mrf.mxu2  ;;  %v756_v39 = vpop.f32.mrf.mxu3 }
 0x1bf   : > { %v684_v36 = vpop.f32.mrf.mxu0  ;;  %v697_v37 = vpop.f32.mrf.mxu1 }
 0x1c0   : > { %v701_v48 = vadd.f32 %v684_v36, %v644_v46  ;;  %v702_v49 = vadd.f32 %v697_v37, %v645_v47 }
 0x1c2   : > { %v758_v50 = vadd.f32 %v741_v30, %v701_v48  ;;  %v759_v51 = vadd.f32 %v754_v31, %v702_v49 }
 0x1c7   : > { %v686_v44 = vpop.f32.mrf.mxu0  ;;  %v699_v45 = vpop.f32.mrf.mxu1 }
 0x1cf   : > { %v798_v52 = vpop.f32.mrf.mxu0  ;;  %v811_v53 = vpop.f32.mrf.mxu1 }
 0x1d0   : > { %v815_v54 = vadd.f32 %v798_v52, %v758_v50  ;;  %v816_v55 = vadd.f32 %v811_v53, %v759_v51 }
 0x1d2   : > { %v817_v56 = vpack.c.bf16 %v816_v55, %v815_v54  ;;  %v819_v57 = vadd.f32 %v816_v55, %v815_v54  ;;  %v824_v58 = vmul.f32 %v815_v54, %v815_v54  ;;  %v825_v59 = vmul.f32 %v816_v55, %v816_v55 }
 0x1d4   : > { %818 = vst [vmem:[%s291_s13] sm:$0xff] %v817_v56  ;;  %820 = vadd.xlane.f32.xlu0 %v819_v57  ;;  %v826_v60 = vadd.f32 %v825_v59, %v824_v58 }
 0x1d6   : > { %827 = vadd.xlane.f32.xlu1 %v826_v60 }
 0x1d7   : > { %v800_v61 = vpop.f32.mrf.mxu0  ;;  %v813_v62 = vpop.f32.mrf.mxu1 }
 0x247   : > { %v821_v63 = vpop.xlane.xlu0 %820 }
 0x248   : > { %823 = vst.msk [vmem:[%s295_s16] sm:$0xff] %vm822_vm10, %v821_v63 }
 0x249   : > { %v828_v16 = vpop.xlane.xlu1 %827 }
 0x24a   : > { %829 = vst.msk [vmem:[%s299_s19] sm:$0xff] %vm822_vm10, %v828_v16 }
 0x24b PF: > { %s18_s24 = sadd.s32 1, %s1019_s24  }
 0x24c   : > { %p15_p4 = scmp.ge.s32.totalorder %s18_s24, 4  }
 0x24e   :  { %17 = sbr.rel (!%p15_p4) target bundleno = 1 (0x1), region = 109 }

</bundles_post_ra>
